<compile_context>
chip_gen: v6e
topology: v6e:2x2x1
jax: 0.10.0
libtpu: 0.0.40
codegen_flags: <defaults>
</compile_context>

<pallas_src>
import functools

import numpy as np
import jax
import jax.numpy as jnp
from jax.experimental import pallas as pl
from jax.experimental.pallas import tpu as pltpu


# ---------------------------------------------------------------------------
# Pallas kernel: fc1 + (decomposed) fc2 + log-softmax + masked_fill, fused.
# ---------------------------------------------------------------------------
def noweek_kernel(scal_ref,    # SMEM (2,)       : [w2_markov, sign]
                  x_ref,       # VMEM (TB, L, N) : x in native layout (bf16 or f32)
                  w1_ref,      # VMEM (1, L, 1)  : fc1 weight pre-scaled by w2_fc1 (f32)
                  dist_ref,    # VMEM (1, N)     : w2_dist * x_dist (f32, resident)
                  markov_ref,  # VMEM (TB, N)    : bf16 or f32
                  mask_ref,    # VMEM (TB, N)    : int8 (nonzero => masked)
                  out_ref):    # VMEM (TB, N)    : f32
    w2_mk = scal_ref[0]
    sign = scal_ref[1]

    # fc1 folded with its fc2 column: reduce over the lookback (sublane) axis.
    # L is tiny, so this stays on VPU/XLU; accumulate in f32.
    fc1 = jnp.sum(x_ref[...].astype(jnp.float32) * w1_ref[...], axis=1)       # (TB, N)

    # decomposed fc2 logits (per-row constants cancel in log_softmax -> omitted)
    score = fc1 + dist_ref[...] + markov_ref[...].astype(jnp.float32) * w2_mk  # (TB, N)

    # log-softmax over nodes (dim=1)
    m = jnp.max(score, axis=1, keepdims=True)
    z = score - m
    lse = jnp.log(jnp.sum(jnp.exp(z), axis=1, keepdims=True))
    logp = z - lse

    # masked_fill AFTER the softmax (masked columns still count in the LSE).
    # sign = +1 (default) or -1 (decision_focused): -where(m,-1e8,lp) == where(m,1e8,-lp)
    out_ref[...] = sign * jnp.where(mask_ref[...] != 0, jnp.float32(-1.0e8), logp)


def noweek_pallas(scal, x, w1, dist, markov, mask, tb):
    B, L, N = x.shape
    assert tb % 32 == 0, "tile must be a multiple of 32 (int8/bf16 sublane tiles)"
    grid = (pl.cdiv(B, tb),)   # ragged last tile handled by Pallas (no host pad)
    return pl.pallas_call(
        noweek_kernel,
        out_shape=jax.ShapeDtypeStruct((B, N), jnp.float32),
        grid=grid,
        in_specs=[
            pl.BlockSpec(memory_space=pltpu.MemorySpace.SMEM),   # scalars
            pl.BlockSpec((tb, L, N), lambda i: (i, 0, 0)),       # x (batch-tiled)
            pl.BlockSpec((1, L, 1), lambda i: (0, 0, 0)),        # w1 * w2_fc1 (resident)
            pl.BlockSpec((1, N), lambda i: (0, 0)),              # w2_dist * x_dist (resident)
            pl.BlockSpec((tb, N), lambda i: (i, 0)),             # markov
            pl.BlockSpec((tb, N), lambda i: (i, 0)),             # mask (int8)
        ],
        out_specs=pl.BlockSpec((tb, N), lambda i: (i, 0)),
        compiler_params=pltpu.CompilerParams(
            dimension_semantics=("parallel",),          # batch tiles over v7x's 2 TCs
            vmem_limit_bytes=32 * 1024 * 1024,          # safe on v5e/v6e/v7x
        ),
    )(scal, x, w1, dist, markov, mask)


# ---------------------------------------------------------------------------
# Jitted forward: tiny XLA glue (weight splits) + the Pallas kernel.
# ---------------------------------------------------------------------------
@functools.partial(jax.jit, static_argnames=("decision_focused", "tb"))
def noweek_forward(params, x, x_dist, x_markov, x_mask,
                   decision_focused=False, tb=None):
    B, L, N = x.shape

    # fc2 weight layout: [x_features (F) | x_embed (S) | fc1_out | x_dist | x_markov]
    # Only the last three columns survive the log_softmax (the per-row terms cancel).
    w2 = params["fc2_w"][0]
    w2_fc1, w2_dist, w2_mk = w2[-3], w2[-2], w2[-1]

    w1s = (params["fc1_w"][0].astype(jnp.float32) * w2_fc1).reshape(1, L, 1)     # (1, L, 1)
    dist = (x_dist.astype(jnp.float32) * w2_dist).reshape(1, N)                   # (1, N)

    sign = jnp.float32(-1.0 if decision_focused else 1.0)
    scal = jnp.stack([w2_mk.astype(jnp.float32), sign])                           # (2,)

    # x / markov / mask are shipped in the dtype the caller provides (bf16 / int8
    # recommended: halves / quarters the HBM streams); the kernel upcasts to f32.
    if tb is None:
        # >= 2 grid steps whenever B > 32 (double-buffering + v7x megacore),
        # tile stays a power-of-two multiple of 32.
        tb = 1024
        while tb > 32 and tb >= B:
            tb //= 2

    return noweek_pallas(scal, x, w1s, dist, x_markov, x_mask, tb)


# ---------------------------------------------------------------------------
# Module wrapper with deterministic synthetic parameters.
# ---------------------------------------------------------------------------
class NoWeekPallas:
    """JAX/Pallas port of comparison_models.NoWeek (forward pass only)."""

    def __init__(self, embedding_size, lookback_period, stop_embedding_size=12,
                 nnodes=74, n_features=2, nweekdays=7, decision_focused=False,
                 key=jax.random.PRNGKey(0)):
        self.nnodes = nnodes
        self.lookback_period = lookback_period
        self.decision_focused = decision_focused
        d2 = n_features + 3 + stop_embedding_size
        ks = jax.random.split(key, 5)
        self.params = {
            "fc1_w": jax.random.normal(ks[0], (1, lookback_period), jnp.float32) * 0.1,
            "fc1_b": jax.random.normal(ks[1], (1,), jnp.float32) * 0.1,
            "fc2_w": jax.random.normal(ks[2], (1, d2), jnp.float32) * 0.1,
            "fc2_b": jax.random.normal(ks[3], (1,), jnp.float32) * 0.1,
            "stop_emb": jax.random.normal(ks[4], (nnodes, stop_embedding_size), jnp.float32),
        }
        # TODO(synk): nn.Dropout and the parent's weekday nn.Embedding are created
        # in __init__ but never used by NoWeek.forward; omitted here.

    def forward(self, stops, x, x_dist, x_features, x_markov, x_week, x_mask, tb=None):
        # stops / x_features / x_week only contribute per-row fc2 terms, which are
        # constant across the node axis and cancel exactly under LogSoftmax(dim=1);
        # the output therefore does not depend on them (x_week is also unused by
        # the PyTorch NoWeek.forward itself).
        del stops, x_features, x_week
        return noweek_forward(self.params,
                              jnp.asarray(x),          # bf16 or f32, kept as given
                              jnp.asarray(x_dist),
                              jnp.asarray(x_markov),   # bf16 or f32, kept as given
                              jnp.asarray(x_mask),     # int8 recommended
                              decision_focused=self.decision_focused, tb=tb)


# ---------------------------------------------------------------------------
# Pure-JAX reference (mirrors the PyTorch forward exactly, incl. the per-row
# terms that the kernel drops) for sanity checking.
# ---------------------------------------------------------------------------
def reference_forward(params, stops, x, x_dist, x_features, x_markov, x_mask,
                      decision_focused=False):
    B, N = x_features.shape[0], x_markov.shape[1]
    x_embed = jnp.stack([params["stop_emb"][jnp.asarray(s, jnp.int32)].sum(0) for s in stops])
    out = jnp.einsum('bln,l->bn', x, params["fc1_w"][0]) + params["fc1_b"][0]   # fc1(x.T)
    full = jnp.concatenate([
        jnp.broadcast_to(x_features[:, None, :], (B, N, x_features.shape[1])),
        jnp.broadcast_to(x_embed[:, None, :], (B, N, x_embed.shape[1])),
        out[..., None],
        jnp.broadcast_to(x_dist[None, :, None], (B, N, 1)),
        x_markov[..., None]], axis=-1)
    logits = full @ params["fc2_w"][0] + params["fc2_b"][0]
    logp = jax.nn.log_softmax(logits, axis=1)
    res = jnp.where(x_mask != 0, jnp.float32(-1.0e8), logp)
    return -res if decision_focused else res


if __name__ == "__main__":
    root = jax.random.PRNGKey(0)
    kparam, kdata = jax.random.split(root)

    # small shapes consistent with the module defaults
    B, L, N = 48, 8, 74          # batch, lookback_period, nnodes
    E, F, S, W = 4, 2, 12, 7     # embedding_size, n_features, stop_embedding_size, nweekdays

    mod = NoWeekPallas(embedding_size=E, lookback_period=L, stop_embedding_size=S,
                       nnodes=N, n_features=F, nweekdays=W, key=kparam)

    ks = jax.random.split(kdata, 6)
    x_f32      = jax.random.normal(ks[0], (B, L, N), jnp.float32)
    x_dist     = jax.random.normal(ks[1], (N,), jnp.float32)
    x_features = jax.random.normal(ks[2], (B, F), jnp.float32)
    x_mark_f32 = jax.random.uniform(ks[3], (B, N), jnp.float32)
    x_week     = jax.random.randint(ks[4], (B,), 0, W)           # unused by NoWeek
    x_mask     = (jax.random.uniform(ks[5], (B, N)) < 0.2).astype(jnp.int8)
    stops      = [[(3 * i + j) % N for j in range(i % 6 + 1)] for i in range(B)]

    # Keep the dominant streams persistently in bf16 (cast once, outside the
    # per-call path) -- halves the HBM traffic of the memory-bound kernel.
    x        = x_f32.astype(jnp.bfloat16)
    x_markov = x_mark_f32.astype(jnp.bfloat16)

    # Default tb=32 here -> grid of 2 tiles with a ragged (16-row) last tile:
    # exercises the no-pad cdiv path and the multi-tile pipeline.
    out = mod.forward(stops, x, x_dist, x_features, x_markov, x_week, x_mask)
    out = jax.block_until_ready(out)

    # reference on the same (bf16-rounded) inputs, full fc2 incl. per-row terms
    ref = reference_forward(mod.params, stops,
                            x.astype(jnp.float32), x_dist, x_features,
                            x_markov.astype(jnp.float32), x_mask)
    np.testing.assert_allclose(np.asarray(out), np.asarray(ref), rtol=1e-4, atol=5e-4)

    print("KERNEL_OK")
</pallas_src>

<mosaic_0001>
module attributes {stable_mosaic.version = 11 : i64} {
  func.func @noweek_kernel(%arg0: i32, %arg1: memref<2xf32, #tpu.memory_space<smem>>, %arg2: memref<32x8x74xbf16, #tpu.memory_space<vmem>>, %arg3: memref<1x8x1xf32, #tpu.memory_space<vmem>>, %arg4: memref<1x74xf32, #tpu.memory_space<vmem>>, %arg5: memref<32x74xbf16, #tpu.memory_space<vmem>>, %arg6: memref<32x74xi8, #tpu.memory_space<vmem>>, %arg7: memref<32x74xf32, #tpu.memory_space<vmem>>) attributes {dimension_semantics = [#tpu.dimension_semantics<parallel>], iteration_bounds = array<i64: 2>, scalar_prefetch = 0 : i64, scratch_operands = 0 : i64, tpu.core_type = #tpu.core_type<tc>, window_params = [{transform_indices = @transform_0, window_bounds = array<i64: 2>}, {transform_indices = @transform_1, window_bounds = array<i64: 32, 8, 74>}, {pipeline_mode = #tpu.pipeline_mode<synchronous>, transform_indices = @transform_2, window_bounds = array<i64: 1, 8, 1>}, {pipeline_mode = #tpu.pipeline_mode<synchronous>, transform_indices = @transform_3, window_bounds = array<i64: 1, 74>}, {transform_indices = @transform_4, window_bounds = array<i64: 32, 74>}, {transform_indices = @transform_5, window_bounds = array<i64: 32, 74>}, {transform_indices = @transform_6, window_bounds = array<i64: 32, 74>}]} {
    %c0 = arith.constant 0 : index
    %0 = memref.load %arg1[%c0] : memref<2xf32, #tpu.memory_space<smem>>
    %c1 = arith.constant 1 : index
    %1 = memref.load %arg1[%c1] : memref<2xf32, #tpu.memory_space<smem>>
    %c0_0 = arith.constant 0 : index
    %c0_1 = arith.constant 0 : index
    %c0_2 = arith.constant 0 : index
    %2 = vector.load %arg2[%c0_0, %c0_1, %c0_2] : memref<32x8x74xbf16, #tpu.memory_space<vmem>>, vector<32x8x74xbf16>
    %3 = arith.extf %2 : vector<32x8x74xbf16> to vector<32x8x74xf32>
    %c0_3 = arith.constant 0 : index
    %c0_4 = arith.constant 0 : index
    %c0_5 = arith.constant 0 : index
    %4 = vector.load %arg3[%c0_3, %c0_4, %c0_5] : memref<1x8x1xf32, #tpu.memory_space<vmem>>, vector<1x8x1xf32>
    %5 = vector.broadcast %4 : vector<1x8x1xf32> to vector<32x8x74xf32>
    %6 = arith.mulf %3, %5 : vector<32x8x74xf32>
    %cst = arith.constant dense<0.000000e+00> : vector<32x74xf32>
    %7 = vector.multi_reduction <add>, %6, %cst [1] : vector<32x8x74xf32> to vector<32x74xf32>
    %c0_6 = arith.constant 0 : index
    %c0_7 = arith.constant 0 : index
    %8 = vector.load %arg4[%c0_6, %c0_7] : memref<1x74xf32, #tpu.memory_space<vmem>>, vector<1x74xf32>
    %9 = vector.broadcast %8 : vector<1x74xf32> to vector<32x74xf32>
    %10 = arith.addf %7, %9 : vector<32x74xf32>
    %c0_8 = arith.constant 0 : index
    %c0_9 = arith.constant 0 : index
    %11 = vector.load %arg5[%c0_8, %c0_9] : memref<32x74xbf16, #tpu.memory_space<vmem>>, vector<32x74xbf16>
    %12 = arith.extf %11 : vector<32x74xbf16> to vector<32x74xf32>
    %13 = vector.broadcast %0 : f32 to vector<32x74xf32>
    %14 = arith.mulf %12, %13 : vector<32x74xf32>
    %15 = arith.addf %10, %14 : vector<32x74xf32>
    %cst_10 = arith.constant dense<0xFF800000> : vector<32xf32>
    %16 = vector.multi_reduction <maximumf>, %15, %cst_10 [1] : vector<32x74xf32> to vector<32xf32>
    %17 = vector.shape_cast %16 : vector<32xf32> to vector<32x1xf32>
    %18 = vector.broadcast %17 : vector<32x1xf32> to vector<32x74xf32>
    %19 = arith.subf %15, %18 : vector<32x74xf32>
    %20 = math.exp %19 : vector<32x74xf32>
    %cst_11 = arith.constant dense<0.000000e+00> : vector<32xf32>
    %21 = vector.multi_reduction <add>, %20, %cst_11 [1] : vector<32x74xf32> to vector<32xf32>
    %22 = vector.shape_cast %21 : vector<32xf32> to vector<32x1xf32>
    %23 = math.log %22 : vector<32x1xf32>
    %24 = vector.broadcast %23 : vector<32x1xf32> to vector<32x74xf32>
    %25 = arith.subf %19, %24 : vector<32x74xf32>
    %c0_12 = arith.constant 0 : index
    %c0_13 = arith.constant 0 : index
    %26 = vector.load %arg6[%c0_12, %c0_13] : memref<32x74xi8, #tpu.memory_space<vmem>>, vector<32x74xi8>
    %c0_i8 = arith.constant 0 : i8
    %27 = vector.broadcast %c0_i8 : i8 to vector<32x74xi8>
    %28 = arith.cmpi ne, %26, %27 : vector<32x74xi8>
    %cst_14 = arith.constant -1.000000e+08 : f32
    %29 = vector.broadcast %cst_14 : f32 to vector<32x74xf32>
    %30 = arith.select %28, %29, %25 : vector<32x74xi1>, vector<32x74xf32>
    %31 = vector.broadcast %1 : f32 to vector<32x74xf32>
    %32 = arith.mulf %31, %30 : vector<32x74xf32>
    %c0_15 = arith.constant 0 : index
    %c0_16 = arith.constant 0 : index
    %33 = vector.load %arg7[%c0_15, %c0_16] : memref<32x74xf32, #tpu.memory_space<vmem>>, vector<32x74xf32>
    tpu.vector_store %arg7[%c0_15, %c0_16], %32 {strides = array<i32>} : memref<32x74xf32, #tpu.memory_space<vmem>>, vector<32x74xf32>,
    return
  }
  func.func @transform_0(%arg0: i32) -> i32 {
    %c0_i32 = arith.constant 0 : i32
    %c0_i32_0 = arith.constant 0 : i32
    return %c0_i32 : i32
  }
  func.func @transform_1(%arg0: i32) -> (i32, i32, i32) {
    %c0_i32 = arith.constant 0 : i32
    %c0_i32_0 = arith.constant 0 : i32
    %c0_i32_1 = arith.constant 0 : i32
    return %arg0, %c0_i32, %c0_i32_0 : i32, i32, i32
  }
  func.func @transform_2(%arg0: i32) -> (i32, i32, i32) {
    %c0_i32 = arith.constant 0 : i32
    %c0_i32_0 = arith.constant 0 : i32
    %c0_i32_1 = arith.constant 0 : i32
    %c0_i32_2 = arith.constant 0 : i32
    return %c0_i32, %c0_i32_0, %c0_i32_1 : i32, i32, i32
  }
  func.func @transform_3(%arg0: i32) -> (i32, i32) {
    %c0_i32 = arith.constant 0 : i32
    %c0_i32_0 = arith.constant 0 : i32
    %c0_i32_1 = arith.constant 0 : i32
    return %c0_i32, %c0_i32_0 : i32, i32
  }
  func.func @transform_4(%arg0: i32) -> (i32, i32) {
    %c0_i32 = arith.constant 0 : i32
    %c0_i32_0 = arith.constant 0 : i32
    return %arg0, %c0_i32 : i32, i32
  }
  func.func @transform_5(%arg0: i32) -> (i32, i32) {
    %c0_i32 = arith.constant 0 : i32
    %c0_i32_0 = arith.constant 0 : i32
    return %arg0, %c0_i32 : i32, i32
  }
  func.func @transform_6(%arg0: i32) -> (i32, i32) {
    %c0_i32 = arith.constant 0 : i32
    %c0_i32_0 = arith.constant 0 : i32
    return %arg0, %c0_i32 : i32, i32
  }
}

</mosaic_0001>

<bundles_post_ra>
// kernel: noweek_forward.1
= control target key start
LH: loop header
LB: loop body
LE: loop exit
PB: predicated region body
PF: predicated region fallthrough
CT: control target
= control target key end

     0   :  { %s3478_s0 = inlined_call_operand.vmem [shape: f32[2], index: 0, kind: input, shape index: {}]   ;;  %s3479_s1 = inlined_call_operand.hbm [shape: bf16[48,8,74], index: 1, kind: input, shape index: {}]   ;;  %s3480_s2 = inlined_call_operand.vmem [shape: f32[1,8,1], index: 2, kind: input, shape index: {}]   ;;  %s3481_s3 = inlined_call_operand.vmem [shape: f32[1,74], index: 3, kind: input, shape index: {}]   ;;  %s3482_s4 = inlined_call_operand.vmem [shape: bf16[48,74], index: 4, kind: input, shape index: {}]   ;;  %s3483_s5 = inlined_call_operand.vmem [shape: s8[48,74], index: 5, kind: input, shape index: {}]   ;;  %s3484_s6 = inlined_call_operand.hbm [shape: f32[48,74], index: 6, kind: output, shape index: {}]  }
   0x1   :  { %3509 = sst [smem:[#allocation23_spill]] %s3478_s0 }
   0x2   :  { %11 = vsyncpa [#allocation5], 0 }
   0x3   :  { %12 = vsyncpa [#allocation3], 0 }
   0x4   :  { %14 = vsyncpa [#allocation3 + $0x1], 0 }
   0x5   :  { %15 = vsyncpa [#allocation4], 0 }
   0x6   :  { %17 = vsyncpa [#allocation4 + $0x1], 0  ;;  %s2218_s21 = smov 0   ;;  %s2220_s22 = smov 0  }
   0x7   :  { %s2222_s23 = smov 0   ;;  %s2224_s24 = smov 0  }
   0x8 LB: > { %s2239_s25 = sadd.s32 4294967295, %s2173_s24   ;;  %s1816_s26 = sadd.s32 4294967294, %s2173_s24   ;;  %s2173_s24 = sphi %s2224_s24, %s3677_s24   ;;  %s2169_s23 = sphi %s2222_s23, %s3676_s23   ;;  %s2165_s22 = sphi %s2220_s22, %s3675_s22   ;;  %s2161_s21 = sphi %s2218_s21, %s3674_s21  }
   0x9   : > { %s2243_s27 = sadd.s32 1, %s2173_s24   ;;  %s51_s28 = sadd.s32 1, %s2169_s23 }
   0xa   : > { %s48_s29 = ssub.s32 %s2173_s24, %s2243_s27  ;;  %p58_p0 = scmp.ne.s32.totalorder %s2169_s23, %s2165_s22 }
   0xb   : > { %p49_p1 = scmp.eq.s32.totalorder %s48_s29, 0  ;;  %p59_p2 = scmp.eq.s32.totalorder %s2173_s24, 0 }
   0xc   : > { %p64_p3 = scmp.ne.s32.totalorder %s2165_s22, %s2161_s21  ;;  %p65_p4 = scmp.eq.s32.totalorder %s2239_s25, 0 }
   0xd   : > { %s2255_s30 = scalar_select %p49_p1, %s2169_s23, %s51_s28  }
   0xe   : > { %p2257_p5 = por %p59_p2, %p58_p0  ;;  %p2263_p6 = por %p65_p4, %p64_p3 }
   0xf   : > { %p182_p7 = scmp.eq.s32.totalorder %s2239_s25, 1  ;;  %p188_p8 = scmp.eq.s32.totalorder %s1816_s26, 1 }
  0x10   : > { %s3511_s8 = scalar_select %p2263_p6, 1, 0 }
  0x11   : > { %p1817_p9 = scmp.ge.s32.totalorder %s2173_s24, 1  ;;  %p195_p10 = scmp.lt.s32.totalorder %s2173_s24, 3 }
  0x12   : > { %p2270_p11 = por %p182_p7, %p58_p0  ;;  %p2274_p12 = por %p188_p8, %p64_p3 }
  0x13   : > { %p2278_p13 = pnand %p1817_p9, %p195_p10  ;;  %s3515_s0 = sld [smem:[#allocation23_spill]] }
  0x14   : > { %s3512_s9 = scalar_select %p2270_p11, 1, 0 }
  0x15   : > { %s3513_s10 = scalar_select %p2274_p12, 1, 0 }
  0x16   : > { %p1942_p1 = pneg %p2278_p13 }
  0x18   : > { %p1943_p0 = pnand %p1942_p1, %p65_p4 }
  0x19   : > { %s208_s14 = sshll.u32 %s3515_s0, 4  ;;  %s209_s14 = int_to_ptr.vmem [resolvable:$true] %s208_s14 }
  0x1a   : > { %s2064_s15 = scalar_lea.vmem %s209_s14, 16  ;;  %p2066_p3 = pneg %p1943_p0 }
  0x1b   : > { %p2065_p2 = scmp.ne.s32.totalorder %s209_s14, %s2064_s15  ;;  %p2072_p12 = scmp.lt.s32.totalorder %s209_s14, %s209_s14 }
  0x1c   : > { %p2073_p9 = scmp.lt.s32.totalorder %s2064_s15, %s2064_s15 }
  0x1d   : > { %p2067_p7 = pnand %p2066_p3, %p2065_p2 }
  0x1e   : > { %p2074_p10 = por %p2073_p9, %p2072_p12 }
  0x1f   : > { %p2068_p8 = pneg %p2067_p7 }
  0x21   : > { %p2075_p11 = pnand %p2074_p10, %p2068_p8 }
  0x23   : > { %2078 = shalt.err (!%p2075_p11)
}
  0x24   : > { %s2175_s16 = smov [#allocation2]   ;;  %p3486_p6 = scmp.ge.s32.totalorder %s2173_s24, 2 }
  0x25   : > { %1945 = dma.vmem_to_smem (!%p1943_p0), %s209_s14, 16, %s2175_s16, [#allocation5]  }
  0x26   : > { %221 = sbr.rel (%p3486_p6) target bundleno = 75 (0x4b), region = 28 }
  0x2b   : > { %224 = sbr.rel (!%p2257_p5) target bundleno = 75 (0x4b), region = 32  ;;  %s225_s17 = sand.u32 (%p2257_p5), 1, %s2169_s23  }
  0x2c   : > { %s1821_s18 = sshll.u32 (%p2257_p5), %s2173_s24, 5  ;;  %s1820_s19 = sshll.u32 (%p2257_p5), %s225_s17, 7 }
  0x2d   : > { %s231_s20 = ssub.s32 (%p2257_p5), 48, %s1821_s18  ;;  %s2299_s29 = scalar_lea.sflag (%p2257_p5), [#allocation3], %s225_s17 }
  0x2e   : > { %p232_p1 = scmp.lt.s32.totalorder (%p2257_p5), %s231_s20, 32  ;;  %s229_s12 = scalar_lea.vmem (%p2257_p5), [#allocation6], %s1820_s19 }
  0x30   : > { %s3679_s20 = smov (!%p232_p1, %s231_s20), 32 }
  0x31   : > { %s2296_s26 = sshll.u32 %s3679_s20, 6 }
  0x32   : > { %s236_s28 = ssub.s32 2048, %s2296_s26 }
  0x33   : > { %237 = vsyncadd %s2299_s29, %s236_s28  ;;  %p1823_p5 = scmp.ne.s32.totalorder %s2296_s26, 0  ;;  %s1846_s7 = sshll.u32 %s2173_s24, 11 }
  0x34   : > { %s2307_s15 = scalar_lea.hbm %s3479_s1, %s1846_s7  ;;  %s242_s16 = sshll.u32 %s229_s12, 4  ;;  %s2309_s16 = int_to_ptr.vmem [resolvable:$true] %s242_s16 }
  0x35   : > { %s2079_s17 = scalar_lea.hbm %s2307_s15, %s2296_s26  ;;  %s2083_s20 = scalar_lea.hbm %s3479_s1, 3072 }
  0x36   : > { %p2080_p11 = scmp.ne.s32.totalorder %s2307_s15, %s2079_s17  ;;  %p2084_p2 = scmp.lt.s32.totalorder %s2307_s15, %s3479_s1 }
  0x37   : > { %p2085_p3 = scmp.lt.s32.totalorder %s2083_s20, %s2079_s17 }
  0x38   : > { %p2081_p12 = pnand %p2080_p11, %p1823_p5 }
  0x39   : > { %p2086_p7 = por %p2085_p3, %p2084_p2 }
  0x3a   : > { %p2082_p0 = pneg %p2081_p12 }
  0x3c   : > { %p2087_p8 = pnand %p2086_p7, %p2082_p0 }
  0x3e   : > { %2090 = shalt.err (!%p2087_p8)
}
  0x3f   : > { %s2091_s12 = scalar_lea.vmem %s2309_s16, %s2296_s26  ;;  %s2176_s7 = smov [#allocation6]  }
  0x40   : > { %p2092_p9 = scmp.ne.s32.totalorder %s2309_s16, %s2091_s12  ;;  %s2095_s13 = sshll.u32 %s2176_s7, 4  ;;  %s2096_s13 = int_to_ptr.vmem [resolvable:$false] %s2095_s13 }
  0x41   : > { %s2097_s14 = scalar_lea.vmem %s2096_s13, 4096  ;;  %p2098_p11 = scmp.lt.s32.totalorder %s2309_s16, %s2096_s13 }
  0x42   : > { %p2093_p10 = pnand %p2092_p9, %p1823_p5  ;;  %p2099_p12 = scmp.lt.s32.totalorder %s2097_s14, %s2091_s12 }
  0x44   : > { %p2094_p1 = pneg %p2093_p10  ;;  %p2100_p6 = por %p2099_p12, %p2098_p11 }
  0x46   : > { %p2101_p2 = pnand %p2100_p6, %p2094_p1 }
  0x48   : > { %2104 = shalt.err (!%p2101_p2)
}
  0x49   : > { %s2177_s0 = smov 64   ;;  %s2178_s17 = smov 4  }
  0x4a   : > { %248 = dma.hbm_to_vmem [thread:$0]  (%p1823_p5), %s2307_s15, %s2296_s26, %s2309_s16, %s2299_s29, %s2177_s0, %s2177_s0, %s2178_s17  }
  0x4b PF: > { %288 = sbr.rel (%p2278_p13) target bundleno = 695 (0x2b7), region = 44 }
  0x50   : > { %2148 = dma.done.wait (%p65_p4), [#allocation5], 16  }
  0x51   : > { %2150 = vsyncadd (%p65_p4), [#allocation5], 4294967280  ;;  %s2342_s18 = sand.u32 1, %s2165_s22   ;;  %p3516_p6 = scmp.ne.s32.totalorder %s3511_s8, 0 }
  0x52   : > { %s1829_s19 = sshll.u32 %s2342_s18, 7  ;;  %s295_s20 = scalar_lea.sflag [#allocation3], %s2342_s18 }
  0x53   : > { %s2346_s26 = scalar_lea.vmem [#allocation6], %s1829_s19 }
  0x54   : > { %2152 = dma.done.wait (%p3516_p6), %s295_s20, 2048  }
  0x55   : > { %2154 = vsyncadd (%p3516_p6), %s295_s20, 4294965248 }
  0x56   : > { %303 = sfence }
  0x57   : > { %v452_v0 = vld [vmem:[%s3480_s2] sm:$0xff]  ;;  %v3487_v1 = vmov 0   ;;  %s2357_s15 = sshll.u32 %s2239_s25, 2  ;;  %s386_s28 = sld [smem:[#allocation2]]  ;;  %v2371_v5 = vld [vmem:[%s2346_s26 + $0x28] sm:$0xff]   ;;  %v2374_v7 = vld [vmem:[%s2346_s26 + $0x30] sm:$0xff]  }
  0x58   : > { %1991 = vset.pattern.permute.xlu0 %v3487_v1  ;;  %p356_p4 = scmp.lt.s32.totalorder %s2357_s15, 5  ;;  %v2368_v3 = vld [vmem:[%s2346_s26 + $0x20] sm:$0xff]   ;;  %v2377_v8 = vld [vmem:[%s2346_s26 + $0x38] sm:$0xff]   ;;  %v2384_v11 = vld [vmem:[%s2346_s26 + $0x8] sm:$0xff]   ;;  %v1870_v13 = vunpack.c.l.bf16 %v2371_v5  ;;  %v1871_v18 = vunpack.c.h.bf16 %v2371_v5  ;;  %v1874_v19 = vunpack.c.l.bf16 %v2374_v7  ;;  %v1875_v20 = vunpack.c.h.bf16 %v2374_v7  ;;  %s3005_s11 = sld [smem:[#allocation2 + $0x1]] }
  0x59   : > { %455 = vperm.xlu0 %1991, %v452_v0   ;;  %v1866_v9 = vunpack.c.l.bf16 %v2368_v3  ;;  %v2381_v10 = vld [vmem:[%s2346_s26] sm:$0xff]   ;;  %v1867_v12 = vunpack.c.h.bf16 %v2368_v3  ;;  %v2391_v15 = vld [vmem:[%s2346_s26 + $0x10] sm:$0xff]   ;;  %v2394_v16 = vld [vmem:[%s2346_s26 + $0x18] sm:$0xff]   ;;  %v1878_v21 = vunpack.c.l.bf16 %v2377_v8  ;;  %v1879_v22 = vunpack.c.h.bf16 %v2377_v8  ;;  %s1830_s29 = sshll.u32 %s2342_s18, 5  ;;  %p3671_p13 = scmp.ne.s32.totalorder %s3512_s9, 0 }
  0x5a   : > { %s2361_s8 = scalar_select %p356_p4, %s2357_s15, 5  ;;  %v1850_v23 = vunpack.c.l.bf16 %v2381_v10  ;;  %v1851_v24 = vunpack.c.h.bf16 %v2381_v10  ;;  %v1854_v25 = vunpack.c.l.bf16 %v2384_v11  ;;  %v1855_v27 = vunpack.c.h.bf16 %v2384_v11  ;;  %v2409_v31 = vld [vmem:[%s2346_s26 + $0x40] sm:$0xff]   ;;  %v2417_v36 = vld [vmem:[%s2346_s26 + $0x48] sm:$0xff]   ;;  %v2420_v37 = vld [vmem:[%s2346_s26 + $0x50] sm:$0xff]  }
  0x5b   : > { %v1858_v28 = vunpack.c.l.bf16 %v2391_v15  ;;  %v1859_v29 = vunpack.c.h.bf16 %v2391_v15  ;;  %v2426_v41 = vld [vmem:[%s2346_s26 + $0x58] sm:$0xff]   ;;  %vm3489_vm0 = vcmask 605184   ;;  %v2440_v55 = vld [vmem:[%s2346_s26 + $0x60] sm:$0xff]   ;;  %v2443_v56 = vld [vmem:[%s2346_s26 + $0x68] sm:$0xff]   ;;  %vm3505_vm1 = vcmask 1041409  }
  0x5c   : > { %s1832_s16 = sshll.u32 %s2361_s8, 2  ;;  %v2451_v61 = vld [vmem:[%s2346_s26 + $0x70] sm:$0xff]   ;;  %v2454_v62 = vld [vmem:[%s2346_s26 + $0x78] sm:$0xff]   ;;  %vm3506_vm2 = vcmask 1042434   ;;  %vm3508_vm3 = vcmask 1043459   ;;  %vm3507_vm4 = vcmask 1044484  }
  0x5d   : > { %s359_s13 = scalar_lea.vmem %s3482_s4, %s1832_s16  ;;  %v762_v6 = vstv %s386_s28  ;;  %vm3492_vm5 = vcmask 1045509   ;;  %vm3491_vm6 = vcmask 1046534   ;;  %vm3490_vm7 = vcmask 1047559   ;;  %s1834_s17 = sshll.u32 %s2361_s8, 1 }
  0x5e   : > { %v1913_v2 = vld [vmem:[%s359_s13] sm:$0xff]   ;;  %v1935_v26 = vld [vmem:[%s359_s13 + $0x8] sm:$0xff]   ;;  %s2998_s26 = scalar_lea.vmem %s3483_s5, %s1834_s17  ;;  %s3204_s8 = scalar_lea.vmem [#allocation7], %s1830_s29 }
  0x5f   : > { %v1915_v4 = vunpack.c.h.bf16 %v1913_v2  ;;  %v1914_v17 = vunpack.c.l.bf16 %v1913_v2  ;;  %v1918_v42 = vunpack.c.l.bf16 %v1935_v26  ;;  %v1919_v46 = vunpack.c.h.bf16 %v1935_v26  ;;  %s1688_s16 = scalar_lea.sflag [#allocation4], %s2342_s18  ;;  %s1696_s28 = ssub.s32 (%p3671_p13), 6, %s2357_s15 }
  0x60   : > { %p1697_p5 = scmp.lt.s32.totalorder (%p3671_p13), %s1696_s28, 4 }
  0x61   : > { %v2388_v14 = vmul.f32 %v1915_v4, %v762_v6  ;;  %v2414_v35 = vmul.f32 %v1914_v17, %v762_v6  ;;  %v2448_v60 = vmul.f32 %v1918_v42, %v762_v6  ;;  %v2459_v4 = vmul.f32 %v1919_v46, %v762_v6 }
  0x63   : > { %v778_v32 = vrot.slane %v2388_v14, 1  ;;  %v779_v33 = vrot.slane %v2388_v14, 2  ;;  %v780_v38 = vrot.slane %v2388_v14, 3  ;;  %v781_v39 = vrot.slane %v2388_v14, 4 }
  0x64   : > { %v782_v40 = vrot.slane %v2388_v14, 5  ;;  %v783_v43 = vrot.slane %v2388_v14, 6  ;;  %v784_v44 = vrot.slane %v2388_v14, 7 }
  0xd4   : > { %v2477_v17 = vpop.permute.xlu0 %455 }
  0xd5   : > { %v466_v1 = vmul.f32 %v1866_v9, %v2477_v17  ;;  %v467_v54 = vmul.f32 %v1867_v12, %v2477_v17  ;;  %v468_v53 = vmul.f32 %v1870_v13, %v2477_v17  ;;  %v469_v52 = vmul.f32 %v1871_v18, %v2477_v17 }
  0xd6   : > { %v470_v46 = vmul.f32 %v1874_v19, %v2477_v17  ;;  %v471_v9 = vmul.f32 %v1875_v20, %v2477_v17  ;;  %v472_v3 = vmul.f32 %v1878_v21, %v2477_v17  ;;  %v473_v12 = vmul.f32 %v1879_v22, %v2477_v17 }
  0xd7   : > { %v547_v13 = vsel %vm3489_vm0, %v466_v1, 0.0  ;;  %v554_v5 = vsel %vm3489_vm0, %v467_v54, 0.0  ;;  %v561_v18 = vsel %vm3489_vm0, %v468_v53, 0.0  ;;  %v568_v19 = vsel %vm3489_vm0, %v469_v52, 0.0 }
  0xd8   : > { %v548_v6 = vrot.slane %v547_v13, 4  ;;  %v555_v50 = vrot.slane %v554_v5, 4  ;;  %v562_v7 = vrot.slane %v561_v18, 4  ;;  %v569_v20 = vrot.slane %v568_v19, 4 }
  0xd9   : > { %v575_v42 = vsel %vm3489_vm0, %v470_v46, 0.0  ;;  %v582_v21 = vsel %vm3489_vm0, %v471_v9, 0.0  ;;  %v589_v26 = vsel %vm3489_vm0, %v472_v3, 0.0  ;;  %v596_v8 = vsel %vm3489_vm0, %v473_v12, 0.0 }
  0xda   : > { %v549_v22 = vadd.f32 %v548_v6, %v547_v13  ;;  %v556_v1 = vadd.f32 %v555_v50, %v554_v5  ;;  %v563_v2 = vadd.f32 %v562_v7, %v561_v18  ;;  %v570_v54 = vadd.f32 %v569_v20, %v568_v19 }
  0xdb   : > { %v576_v49 = vrot.slane %v575_v42, 4  ;;  %v583_v53 = vrot.slane %v582_v21, 4  ;;  %v590_v0 = vrot.slane %v589_v26, 4  ;;  %v597_v52 = vrot.slane %v596_v8, 4 }
  0xdc   : > { %v550_v48 = vrot.slane %v549_v22, 2  ;;  %v557_v63 = vrot.slane %v556_v1, 2  ;;  %v564_v47 = vrot.slane %v563_v2, 2  ;;  %v571_v59 = vrot.slane %v570_v54, 2 }
  0xdd   : > { %v577_v45 = vadd.f32 %v576_v49, %v575_v42  ;;  %v584_v46 = vadd.f32 %v583_v53, %v582_v21  ;;  %v591_v58 = vadd.f32 %v590_v0, %v589_v26  ;;  %v598_v9 = vadd.f32 %v597_v52, %v596_v8 }
  0xde   : > { %v551_v57 = vadd.f32 %v550_v48, %v549_v22  ;;  %v558_v3 = vadd.f32 %v557_v63, %v556_v1  ;;  %v565_v51 = vadd.f32 %v564_v47, %v563_v2  ;;  %v572_v12 = vadd.f32 %v571_v59, %v570_v54  ;;  %v2518_v48 = vld [vmem:[%s3481_s3] ss:$0 sm:$0xff] }
  0xdf   : > { %v578_v6 = vrot.slane %v577_v45, 2  ;;  %v585_v50 = vrot.slane %v584_v46, 2  ;;  %v592_v13 = vrot.slane %v591_v58, 2  ;;  %v599_v5 = vrot.slane %v598_v9, 2 }
  0xe0   : > { %v552_v18 = vrot.slane %v551_v57, 1  ;;  %v559_v19 = vrot.slane %v558_v3, 1  ;;  %v566_v7 = vrot.slane %v565_v51, 1  ;;  %v573_v20 = vrot.slane %v572_v12, 1 }
  0xe1   : > { %v579_v34 = vadd.f32 %v578_v6, %v577_v45  ;;  %v586_v30 = vadd.f32 %v585_v50, %v584_v46  ;;  %v593_v49 = vadd.f32 %v592_v13, %v591_v58  ;;  %v600_v42 = vadd.f32 %v599_v5, %v598_v9 }
  0xe2   : > { %v553_v47 = vadd.f32 %v552_v18, %v551_v57  ;;  %v560_v59 = vadd.f32 %v559_v19, %v558_v3  ;;  %v567_v63 = vadd.f32 %v566_v7, %v565_v51  ;;  %v574_v0 = vadd.f32 %v573_v20, %v572_v12 }
  0xe3   : > { %v580_v2 = vrot.slane %v579_v34, 1  ;;  %v587_v26 = vrot.slane %v586_v30, 1  ;;  %v594_v21 = vrot.slane %v593_v49, 1  ;;  %v601_v8 = vrot.slane %v600_v42, 1 }
  0xe4   : > { %v730_v45 = vadd.f32 %v2518_v48, %v553_v47  ;;  %v731_v58 = vadd.f32 %v2518_v48, %v560_v59  ;;  %v732_v22 = vadd.f32 %v2518_v48, %v567_v63  ;;  %v733_v1 = vadd.f32 %v2518_v48, %v574_v0 }
  0xe5   : > { %v581_v54 = vadd.f32 %v580_v2, %v579_v34  ;;  %v588_v57 = vadd.f32 %v587_v26, %v586_v30  ;;  %v595_v53 = vadd.f32 %v594_v21, %v593_v49  ;;  %v602_v51 = vadd.f32 %v601_v8, %v600_v42 }
  0xe6   : > { %v2525_v52 = vadd.f32 %v2388_v14, %v730_v45  ;;  %v2529_v46 = vadd.f32 %v778_v32, %v731_v58  ;;  %v2533_v9 = vadd.f32 %v779_v33, %v732_v22  ;;  %v2537_v3 = vadd.f32 %v780_v38, %v733_v1 }
  0xe7   : > { %v734_v30 = vadd.f32 %v2518_v48, %v581_v54  ;;  %v735_v34 = vadd.f32 %v2518_v48, %v588_v57  ;;  %v736_v12 = vadd.f32 %v2518_v48, %v595_v53  ;;  %v737_v6 = vadd.f32 %v2518_v48, %v602_v51 }
  0xe8   : > { %v916_v50 = vrot.slane %v2529_v46, 7  ;;  %v918_v32 = vrot.slane %v2533_v9, 6  ;;  %v920_v13 = vrot.slane %v2537_v3, 5  ;;  %v458_v33 = vmul.f32 %v1850_v23, %v2477_v17 }
  0xe9   : > { %v2551_v38 = vadd.f32 %v781_v39, %v734_v30  ;;  %v2555_v5 = vadd.f32 %v782_v40, %v735_v34  ;;  %v2559_v18 = vadd.f32 %v783_v43, %v736_v12  ;;  %v2563_v19 = vadd.f32 %v784_v44, %v737_v6 }
  0xea   : > { %v917_v7 = vsel %vm3505_vm1, %v916_v50, %v2525_v52  ;;  %v459_v23 = vmul.f32 %v1851_v24, %v2477_v17  ;;  %v460_v39 = vmul.f32 %v1854_v25, %v2477_v17  ;;  %v461_v40 = vmul.f32 %v1855_v27, %v2477_v17 }
  0xeb   : > { %v919_v43 = vsel %vm3506_vm2, %v918_v32, %v917_v7  ;;  %v922_v14 = vrot.slane %v2551_v38, 4  ;;  %v924_v44 = vrot.slane %v2555_v5, 3  ;;  %v926_v20 = vrot.slane %v2559_v18, 2 }
  0xec   : > { %v921_v49 = vsel %vm3508_vm3, %v920_v13, %v919_v43  ;;  %v928_v10 = vrot.slane %v2563_v19, 1  ;;  %v462_v24 = vmul.f32 %v1858_v28, %v2477_v17  ;;  %v463_v11 = vmul.f32 %v1859_v29, %v2477_v17 }
  0xed   : > { %v923_v25 = vsel %vm3507_vm4, %v922_v14, %v921_v49  ;;  %v3517_v27 = vunpack.c.l.bf16 %v2394_v16  ;;  %v3518_v47 = vunpack.c.h.bf16 %v2394_v16  ;;  %v491_v63 = vsel %vm3489_vm0, %v458_v33, 0.0 }
  0xee   : > { %v925_v0 = vsel %vm3492_vm5, %v924_v44, %v923_v25  ;;  %v492_v2 = vrot.slane %v491_v63, 4  ;;  %v498_v28 = vsel %vm3489_vm0, %v459_v23, 0.0  ;;  %v505_v15 = vsel %vm3489_vm0, %v460_v39, 0.0 }
  0xef   : > { %v464_v42 = vmul.f32 %v3517_v27, %v2477_v17  ;;  %v465_v59 = vmul.f32 %v3518_v47, %v2477_v17  ;;  %v927_v29 = vsel %vm3491_vm6, %v926_v20, %v925_v0  ;;  %v499_v26 = vrot.slane %v498_v28, 4 }
  0xf0   : > { %v506_v21 = vrot.slane %v505_v15, 4  ;;  %v512_v8 = vsel %vm3489_vm0, %v461_v40, 0.0  ;;  %v929_v45 = vsel %vm3490_vm7, %v928_v10, %v927_v29  ;;  %v493_v58 = vadd.f32 %v492_v2, %v491_v63 }
  0xf1   : > { %v513_v16 = vrot.slane %v512_v8, 4  ;;  %v519_v22 = vsel %vm3489_vm0, %v462_v24, 0.0  ;;  %v965_v1 = vsel %vm3489_vm0, %v929_v45, -inf  ;;  %v500_v54 = vadd.f32 %v499_v26, %v498_v28 }
  0xf2   : > { %v507_v57 = vadd.f32 %v506_v21, %v505_v15  ;;  %v520_v53 = vrot.slane %v519_v22, 4  ;;  %966 = vmax.xlane.f32.xlu1 %v965_v1  ;;  %v494_v51 = vrot.slane %v493_v58, 2  ;;  %v526_v34 = vsel %vm3489_vm0, %v463_v11, 0.0 }
  0xf3   : > { %v514_v30 = vadd.f32 %v513_v16, %v512_v8  ;;  %v533_v12 = vsel %vm3489_vm0, %v464_v42, 0.0  ;;  %v501_v6 = vrot.slane %v500_v54, 2  ;;  %v527_v13 = vrot.slane %v526_v34, 4 }
  0xf4   : > { %v508_v50 = vrot.slane %v507_v57, 2  ;;  %v521_v32 = vadd.f32 %v520_v53, %v519_v22  ;;  %v495_v33 = vadd.f32 %v494_v51, %v493_v58  ;;  %v534_v23 = vrot.slane %v533_v12, 4 }
  0xf5   : > { %v515_v7 = vrot.slane %v514_v30, 2  ;;  %v540_v39 = vsel %vm3489_vm0, %v465_v59, 0.0  ;;  %v502_v40 = vadd.f32 %v501_v6, %v500_v54  ;;  %v528_v44 = vadd.f32 %v527_v13, %v526_v34 }
  0xf6   : > { %v509_v43 = vadd.f32 %v508_v50, %v507_v57  ;;  %v522_v14 = vrot.slane %v521_v32, 2  ;;  %v496_v20 = vrot.slane %v495_v33, 1  ;;  %v535_v10 = vadd.f32 %v534_v23, %v533_v12 }
  0xf7   : > { %v516_v49 = vadd.f32 %v515_v7, %v514_v30  ;;  %v541_v24 = vrot.slane %v540_v39, 4  ;;  %v503_v11 = vrot.slane %v502_v40, 1  ;;  %v529_v42 = vrot.slane %v528_v44, 2 }
  0xf8   : > { %v510_v25 = vrot.slane %v509_v43, 1  ;;  %v523_v27 = vadd.f32 %v522_v14, %v521_v32  ;;  %v497_v47 = vadd.f32 %v496_v20, %v495_v33  ;;  %v536_v0 = vrot.slane %v535_v10, 2 }
  0xf9   : > { %v517_v63 = vrot.slane %v516_v49, 1  ;;  %v542_v2 = vadd.f32 %v541_v24, %v540_v39  ;;  %v504_v28 = vadd.f32 %v503_v11, %v502_v40  ;;  %v530_v59 = vadd.f32 %v529_v42, %v528_v44 }
  0xfa   : > { %v511_v15 = vadd.f32 %v510_v25, %v509_v43  ;;  %v524_v29 = vrot.slane %v523_v27, 1  ;;  %v537_v21 = vadd.f32 %v536_v0, %v535_v10  ;;  %v722_v45 = vadd.f32 %v2518_v48, %v497_v47 }
  0xfb   : > { %v518_v26 = vadd.f32 %v517_v63, %v516_v49  ;;  %v543_v8 = vrot.slane %v542_v2, 2  ;;  %v531_v16 = vrot.slane %v530_v59, 1  ;;  %v723_v22 = vadd.f32 %v2518_v48, %v504_v28 }
  0xfc   : > { %v525_v58 = vadd.f32 %v524_v29, %v523_v27  ;;  %v724_v1 = vadd.f32 %v2518_v48, %v511_v15  ;;  %v538_v54 = vrot.slane %v537_v21, 1  ;;  %v2612_v51 = vadd.f32 %v2414_v35, %v722_v45 }
  0xfd   : > { %v544_v57 = vadd.f32 %v543_v8, %v542_v2  ;;  %v725_v53 = vadd.f32 %v2518_v48, %v518_v26  ;;  %v532_v30 = vadd.f32 %v531_v16, %v530_v59  ;;  %v3519_v12 = vrot.slane %v2414_v35, 1 }
  0xfe   : > { %v726_v34 = vadd.f32 %v2518_v48, %v525_v58  ;;  %v3520_v50 = vrot.slane %v2414_v35, 2  ;;  %v539_v13 = vadd.f32 %v538_v54, %v537_v21  ;;  %v3521_v7 = vrot.slane %v2414_v35, 3 }
  0xff   : > { %v2617_v6 = vadd.f32 %v3519_v12, %v723_v22  ;;  %v545_v33 = vrot.slane %v544_v57, 1  ;;  %v3522_v39 = vunpack.c.l.bf16 %v2409_v31  ;;  %v727_v43 = vadd.f32 %v2518_v48, %v532_v30 }
 0x100   : > { %v2621_v32 = vadd.f32 %v3520_v50, %v724_v1  ;;  %v2625_v23 = vadd.f32 %v3521_v7, %v725_v53  ;;  %v3523_v14 = vrot.slane %v2414_v35, 4  ;;  %v728_v24 = vadd.f32 %v2518_v48, %v539_v13 }
 0x101   : > { %v474_v40 = vmul.f32 %v3522_v39, %v2477_v17  ;;  %v895_v20 = vrot.slane %v2617_v6, 7  ;;  %v546_v10 = vadd.f32 %v545_v33, %v544_v57  ;;  %v3524_v25 = vunpack.c.h.bf16 %v2409_v31 }
 0x102   : > { %v2633_v44 = vadd.f32 %v3523_v14, %v726_v34  ;;  %v898_v49 = vrot.slane %v2621_v32, 6  ;;  %v901_v11 = vrot.slane %v2625_v23, 5  ;;  %v3525_v42 = vrot.slane %v2414_v35, 5 }
 0x103   : > { %v475_v27 = vmul.f32 %v3524_v25, %v2477_v17  ;;  %v897_v63 = vsel %vm3505_vm1, %v895_v20, %v2612_v51  ;;  %v3526_v2 = vunpack.c.l.bf16 %v2417_v36  ;;  %v729_v15 = vadd.f32 %v2518_v48, %v546_v10 }
 0x104   : > { %v2644_v47 = vadd.f32 %v3525_v42, %v727_v43  ;;  %v904_v0 = vrot.slane %v2633_v44, 4  ;;  %v3527_v29 = vrot.slane %v2414_v35, 6  ;;  %v900_v31 = vsel %vm3506_vm2, %v898_v49, %v897_v63 }
 0x105   : > { %v476_v28 = vmul.f32 %v3526_v2, %v2477_v17  ;;  %v3528_v26 = vunpack.c.h.bf16 %v2417_v36  ;;  %v903_v8 = vsel %vm3508_vm3, %v901_v11, %v900_v31  ;;  %v3529_v58 = vunpack.c.l.bf16 %v2420_v37 }
 0x106   : > { %v2655_v59 = vadd.f32 %v3527_v29, %v728_v24  ;;  %v907_v45 = vrot.slane %v2644_v47, 3  ;;  %v3530_v22 = vunpack.c.h.bf16 %v2420_v37  ;;  %v3531_v54 = vrot.slane %v2414_v35, 7 }
 0x107   : > { %v477_v21 = vmul.f32 %v3528_v26, %v2477_v17  ;;  %v478_v16 = vmul.f32 %v3529_v58, %v2477_v17  ;;  %v906_v53 = vsel %vm3507_vm4, %v904_v0, %v903_v8  ;;  %v3532_v30 = vunpack.c.l.bf16 %v2426_v41 }
 0x108   : > { %v479_v1 = vmul.f32 %v3530_v22, %v2477_v17  ;;  %v2671_v57 = vadd.f32 %v3531_v54, %v729_v15  ;;  %v910_v36 = vrot.slane %v2655_v59, 2  ;;  %v909_v12 = vsel %vm3492_vm5, %v907_v45, %v906_v53 }
 0x109   : > { %v480_v34 = vmul.f32 %v3532_v30, %v2477_v17  ;;  %v3533_v50 = vunpack.c.h.bf16 %v2426_v41  ;;  %v603_v37 = vsel %vm3489_vm0, %v474_v40, 0.0  ;;  %v610_v35 = vsel %vm3489_vm0, %v475_v27, 0.0 }
 0x10a   : > { %v912_v33 = vsel %vm3491_vm6, %v910_v36, %v909_v12  ;;  %v913_v7 = vrot.slane %v2671_v57, 1  ;;  %v604_v39 = vrot.slane %v603_v37, 4  ;;  %v611_v43 = vrot.slane %v610_v35, 4 }
 0x10b   : > { %v481_v13 = vmul.f32 %v3533_v50, %v2477_v17  ;;  %v617_v14 = vsel %vm3489_vm0, %v476_v28, 0.0  ;;  %v624_v20 = vsel %vm3489_vm0, %v477_v21, 0.0  ;;  %v631_v49 = vsel %vm3489_vm0, %v478_v16, 0.0 }
 0x10c   : > { %v638_v10 = vsel %vm3489_vm0, %v479_v1, 0.0  ;;  %v915_v41 = vsel %vm3490_vm7, %v913_v7, %v912_v33  ;;  %v605_v24 = vadd.f32 %v604_v39, %v603_v37  ;;  %v612_v40 = vadd.f32 %v611_v43, %v610_v35 }
 0x10d   : > { %v618_v11 = vrot.slane %v617_v14, 4  ;;  %v962_v25 = vsel %vm3489_vm0, %v915_v41, -inf  ;;  %v625_v27 = vrot.slane %v624_v20, 4  ;;  %v632_v42 = vrot.slane %v631_v49, 4 }
 0x10e   : > { %v639_v63 = vrot.slane %v638_v10, 4  ;;  %963 = vmax.xlane.f32.xlu0 %v962_v25  ;;  %v606_v0 = vrot.slane %v605_v24, 2  ;;  %v613_v2 = vrot.slane %v612_v40, 2  ;;  %v645_v15 = vsel %vm3489_vm0, %v480_v34, 0.0 }
 0x10f   : > { %v619_v28 = vadd.f32 %v618_v11, %v617_v14  ;;  %v626_v29 = vadd.f32 %v625_v27, %v624_v20  ;;  %v633_v31 = vadd.f32 %v632_v42, %v631_v49  ;;  %v646_v21 = vrot.slane %v645_v15, 4 }
 0x110   : > { %v640_v26 = vadd.f32 %v639_v63, %v638_v10  ;;  %v607_v8 = vadd.f32 %v606_v0, %v605_v24  ;;  %v614_v45 = vadd.f32 %v613_v2, %v612_v40  ;;  %v652_v16 = vsel %vm3489_vm0, %v481_v13, 0.0 }
 0x111   : > { %v620_v58 = vrot.slane %v619_v28, 2  ;;  %v627_v22 = vrot.slane %v626_v29, 2  ;;  %v634_v1 = vrot.slane %v633_v31, 2  ;;  %v647_v53 = vadd.f32 %v646_v21, %v645_v15 }
 0x112   : > { %v641_v54 = vrot.slane %v640_v26, 2  ;;  %v608_v36 = vrot.slane %v607_v8, 1  ;;  %v615_v30 = vrot.slane %v614_v45, 1  ;;  %v653_v50 = vrot.slane %v652_v16, 4 }
 0x113   : > { %v621_v12 = vadd.f32 %v620_v58, %v619_v28  ;;  %v628_v37 = vadd.f32 %v627_v22, %v626_v29  ;;  %v635_v35 = vadd.f32 %v634_v1, %v633_v31  ;;  %v648_v33 = vrot.slane %v647_v53, 2 }
 0x114   : > { %v642_v34 = vadd.f32 %v641_v54, %v640_v26  ;;  %v609_v7 = vadd.f32 %v608_v36, %v607_v8  ;;  %v616_v39 = vadd.f32 %v615_v30, %v614_v45  ;;  %v654_v14 = vadd.f32 %v653_v50, %v652_v16 }
 0x115   : > { %v622_v43 = vrot.slane %v621_v12, 1  ;;  %v629_v20 = vrot.slane %v628_v37, 1  ;;  %v636_v49 = vrot.slane %v635_v35, 1  ;;  %v649_v13 = vadd.f32 %v648_v33, %v647_v53 }
 0x116   : > { %v643_v10 = vrot.slane %v642_v34, 1  ;;  %v655_v24 = vrot.slane %v654_v14, 2  ;;  %v738_v40 = vadd.f32 %v2518_v48, %v609_v7  ;;  %v739_v11 = vadd.f32 %v2518_v48, %v616_v39 }
 0x117   : > { %v623_v41 = vadd.f32 %v622_v43, %v621_v12  ;;  %v630_v25 = vadd.f32 %v629_v20, %v628_v37  ;;  %v637_v27 = vadd.f32 %v636_v49, %v635_v35  ;;  %v650_v63 = vrot.slane %v649_v13, 1 }
 0x118   : > { %v644_v42 = vadd.f32 %v643_v10, %v642_v34  ;;  %v656_v0 = vadd.f32 %v655_v24, %v654_v14  ;;  %v2698_v28 = vadd.f32 %v2448_v60, %v738_v40  ;;  %v3534_v15 = vrot.slane %v2448_v60, 1 }
 0x119   : > { %v740_v2 = vadd.f32 %v2518_v48, %v623_v41  ;;  %v651_v31 = vadd.f32 %v650_v63, %v649_v13  ;;  %v741_v26 = vadd.f32 %v2518_v48, %v630_v25  ;;  %v742_v21 = vadd.f32 %v2518_v48, %v637_v27 }
 0x11a   : > { %v2702_v29 = vadd.f32 %v3534_v15, %v739_v11  ;;  %v743_v8 = vadd.f32 %v2518_v48, %v644_v42  ;;  %v657_v45 = vrot.slane %v656_v0, 1  ;;  %v3535_v58 = vrot.slane %v2448_v60, 2 }
 0x11b   : > { %v3536_v1 = vunpack.c.l.bf16 %v2440_v55  ;;  %v744_v53 = vadd.f32 %v2518_v48, %v651_v31  ;;  %v3537_v36 = vrot.slane %v2448_v60, 3  ;;  %v3538_v12 = vrot.slane %v2448_v60, 4 }
 0x11c   : > { %v2709_v16 = vadd.f32 %v3535_v58, %v740_v2  ;;  %v930_v22 = vrot.slane %v2702_v29, 7  ;;  %v3539_v37 = vrot.slane %v2448_v60, 5  ;;  %v658_v34 = vadd.f32 %v657_v45, %v656_v0 }
 0x11d   : > { %v482_v54 = vmul.f32 %v3536_v1, %v2477_v17  ;;  %v2718_v30 = vadd.f32 %v3537_v36, %v741_v26  ;;  %v2722_v50 = vadd.f32 %v3538_v12, %v742_v21  ;;  %v3540_v39 = vunpack.c.h.bf16 %v2440_v55 }
 0x11e   : > { %v2726_v35 = vadd.f32 %v3539_v37, %v743_v8  ;;  %v931_v33 = vsel %vm3505_vm1, %v930_v22, %v2698_v28  ;;  %v932_v7 = vrot.slane %v2709_v16, 6  ;;  %v3541_v14 = vrot.slane %v2448_v60, 6 }
 0x11f   : > { %v483_v43 = vmul.f32 %v3540_v39, %v2477_v17  ;;  %v934_v49 = vrot.slane %v2718_v30, 5  ;;  %v936_v10 = vrot.slane %v2722_v50, 4  ;;  %v745_v41 = vadd.f32 %v2518_v48, %v658_v34 }
 0x120   : > { %v2736_v20 = vadd.f32 %v3541_v14, %v744_v53  ;;  %v938_v13 = vrot.slane %v2726_v35, 3  ;;  %v933_v24 = vsel %vm3506_vm2, %v932_v7, %v931_v33  ;;  %v3542_v40 = vunpack.c.l.bf16 %v2443_v56 }
 0x121   : > { %v3543_v55 = vunpack.c.h.bf16 %v2443_v56  ;;  %v935_v27 = vsel %vm3508_vm3, %v934_v49, %v933_v24  ;;  %v3544_v63 = vunpack.c.l.bf16 %v2451_v61  ;;  %v3545_v2 = vunpack.c.h.bf16 %v2451_v61 }
 0x122   : > { %v484_v11 = vmul.f32 %v3542_v40, %v2477_v17  ;;  %v940_v42 = vrot.slane %v2736_v20, 2  ;;  %v3546_v31 = vrot.slane %v2448_v60, 7  ;;  %v937_v21 = vsel %vm3507_vm4, %v936_v10, %v935_v27 }
 0x123   : > { %v485_v25 = vmul.f32 %v3543_v55, %v2477_v17  ;;  %v486_v0 = vmul.f32 %v3544_v63, %v2477_v17  ;;  %v487_v15 = vmul.f32 %v3545_v2, %v2477_v17  ;;  %v3547_v56 = vunpack.c.l.bf16 %v2454_v62 }
 0x124   : > { %v2759_v26 = vadd.f32 %v3546_v31, %v745_v41  ;;  %v3548_v45 = vunpack.c.h.bf16 %v2454_v62  ;;  %v939_v22 = vsel %vm3492_vm5, %v938_v13, %v937_v21  ;;  %v659_v1 = vsel %vm3489_vm0, %v482_v54, 0.0 }
 0x125   : > { %v488_v8 = vmul.f32 %v3547_v56, %v2477_v17  ;;  %v666_v61 = vsel %vm3489_vm0, %v483_v43, 0.0  ;;  %v673_v60 = vsel %vm3489_vm0, %v484_v11, 0.0  ;;  %v941_v53 = vsel %vm3491_vm6, %v940_v42, %v939_v22 }
 0x126   : > { %v489_v58 = vmul.f32 %v3548_v45, %v2477_v17  ;;  %v942_v36 = vrot.slane %v2759_v26, 1  ;;  %v660_v12 = vrot.slane %v659_v1, 4  ;;  %v667_v37 = vrot.slane %v666_v61, 4 }
 0x127   : > { %v674_v34 = vrot.slane %v673_v60, 4  ;;  %v680_v33 = vsel %vm3489_vm0, %v485_v25, 0.0  ;;  %v687_v62 = vsel %vm3489_vm0, %v486_v0, 0.0  ;;  %v694_v17 = vsel %vm3489_vm0, %v487_v15, 0.0 }
 0x128   : > { %v943_v7 = vsel %vm3490_vm7, %v942_v36, %v941_v53  ;;  %v661_v54 = vadd.f32 %v660_v12, %v659_v1  ;;  %v668_v39 = vadd.f32 %v667_v37, %v666_v61  ;;  %v681_v43 = vrot.slane %v680_v33, 4 }
 0x129   : > { %v968_v14 = vsel %vm3489_vm0, %v943_v7, -inf  ;;  %v675_v49 = vadd.f32 %v674_v34, %v673_v60  ;;  %v688_v10 = vrot.slane %v687_v62, 4  ;;  %v695_v13 = vrot.slane %v694_v17, 4 }
 0x12a   : > { %969 = vmax.xlane.f32.xlu1 %v968_v14  ;;  %v662_v41 = vrot.slane %v661_v54, 2  ;;  %v669_v24 = vrot.slane %v668_v39, 2  ;;  %v682_v40 = vadd.f32 %v681_v43, %v680_v33  ;;  %v701_v11 = vsel %vm3489_vm0, %v488_v8, 0.0 }
 0x12b   : > { %v676_v55 = vrot.slane %v675_v49, 2  ;;  %v689_v25 = vadd.f32 %v688_v10, %v687_v62  ;;  %v696_v27 = vadd.f32 %v695_v13, %v694_v17  ;;  %v702_v42 = vrot.slane %v701_v11, 4 }
 0x12c   : > { %v663_v63 = vadd.f32 %v662_v41, %v661_v54  ;;  %v670_v0 = vadd.f32 %v669_v24, %v668_v39  ;;  %v683_v2 = vrot.slane %v682_v40, 2  ;;  %v708_v15 = vsel %vm3489_vm0, %v489_v58, 0.0 }
 0x12d   : > { %v677_v31 = vadd.f32 %v676_v55, %v675_v49  ;;  %v690_v21 = vrot.slane %v689_v25, 2  ;;  %v697_v56 = vrot.slane %v696_v27, 2  ;;  %v703_v45 = vadd.f32 %v702_v42, %v701_v11 }
 0x12e   : > { %v664_v22 = vrot.slane %v663_v63, 1  ;;  %v671_v1 = vrot.slane %v670_v0, 1  ;;  %v684_v61 = vadd.f32 %v683_v2, %v682_v40  ;;  %v709_v60 = vrot.slane %v708_v15, 4 }
 0x12f   : > { %v678_v53 = vrot.slane %v677_v31, 1  ;;  %v691_v36 = vadd.f32 %v690_v21, %v689_v25  ;;  %v698_v8 = vadd.f32 %v697_v56, %v696_v27  ;;  %v704_v12 = vrot.slane %v703_v45, 2 }
 0x130   : > { %v665_v37 = vadd.f32 %v664_v22, %v663_v63  ;;  %v672_v34 = vadd.f32 %v671_v1, %v670_v0  ;;  %v685_v33 = vrot.slane %v684_v61, 1  ;;  %v710_v62 = vadd.f32 %v709_v60, %v708_v15 }
 0x131   : > { %v679_v17 = vadd.f32 %v678_v53, %v677_v31  ;;  %v692_v7 = vrot.slane %v691_v36, 1  ;;  %v699_v54 = vrot.slane %v698_v8, 1  ;;  %v705_v58 = vadd.f32 %v704_v12, %v703_v45 }
 0x132   : > { %v686_v39 = vadd.f32 %v685_v33, %v684_v61  ;;  %v711_v43 = vrot.slane %v710_v62, 2  ;;  %v746_v14 = vadd.f32 %v2518_v48, %v665_v37  ;;  %v747_v49 = vadd.f32 %v2518_v48, %v672_v34 }
 0x133   : > { %v693_v10 = vadd.f32 %v692_v7, %v691_v36  ;;  %v700_v13 = vadd.f32 %v699_v54, %v698_v8  ;;  %v706_v41 = vrot.slane %v705_v58, 1  ;;  %v748_v24 = vadd.f32 %v2518_v48, %v679_v17 }
 0x134   : > { %v712_v40 = vadd.f32 %v711_v43, %v710_v62  ;;  %v749_v11 = vadd.f32 %v2518_v48, %v686_v39  ;;  %v797_v55 = vrot.slane %v2459_v4, 6  ;;  %v3549_v25 = vrot.slane %v2459_v4, 1 }
 0x135   : > { %v707_v42 = vadd.f32 %v706_v41, %v705_v58  ;;  %v750_v63 = vadd.f32 %v2518_v48, %v693_v10  ;;  %v751_v0 = vadd.f32 %v2518_v48, %v700_v13  ;;  %v3550_v2 = vrot.slane %v2459_v4, 2 }
 0x136   : > { %v2788_v27 = vadd.f32 %v3549_v25, %v747_v49  ;;  %v713_v31 = vrot.slane %v712_v40, 1  ;;  %v2797_v21 = vadd.f32 %v2459_v4, %v746_v14  ;;  %v3551_v56 = vrot.slane %v2459_v4, 3 }
 0x137   : > { %v2794_v15 = vadd.f32 %v3550_v2, %v748_v24  ;;  %v752_v1 = vadd.f32 %v2518_v48, %v707_v42  ;;  %v3552_v61 = vrot.slane %v2459_v4, 4  ;;  %v3553_v53 = vrot.slane %v2459_v4, 5 }
 0x138   : > { %v2801_v45 = vadd.f32 %v3551_v56, %v749_v11  ;;  %v944_v22 = vrot.slane %v2788_v27, 7  ;;  %v714_v12 = vadd.f32 %v713_v31, %v712_v40  ;;  %v798_v37 = vrot.slane %v2459_v4, 7 }
 0x139   : > { %v2807_v60 = vadd.f32 %v3552_v61, %v750_v63  ;;  %v2811_v36 = vadd.f32 %v3553_v53, %v751_v0  ;;  %v946_v8 = vrot.slane %v2794_v15, 6  ;;  %v2818_v62 = vadd.f32 %v797_v55, %v752_v1 }
 0x13a   : > { %v945_v34 = vsel %vm3505_vm1, %v944_v22, %v2797_v21  ;;  %v948_v33 = vrot.slane %v2801_v45, 5  ;;  %v753_v54 = vadd.f32 %v2518_v48, %v714_v12 }
 0x13b   : > { %v947_v17 = vsel %vm3506_vm2, %v946_v8, %v945_v34  ;;  %v950_v7 = vrot.slane %v2807_v60, 4  ;;  %v952_v39 = vrot.slane %v2811_v36, 3  ;;  %v954_v4 = vrot.slane %v2818_v62, 2 }
 0x13c   : > { %v949_v58 = vsel %vm3508_vm3, %v948_v33, %v947_v17  ;;  %v2827_v14 = vadd.f32 %v798_v37, %v753_v54 }
 0x13d   : > { %v951_v43 = vsel %vm3507_vm4, %v950_v7, %v949_v58 }
 0x13e   : > { %v953_v49 = vsel %vm3492_vm5, %v952_v39, %v951_v43  ;;  %v956_v13 = vrot.slane %v2827_v14, 1 }
 0x13f   : > { %v955_v10 = vsel %vm3491_vm6, %v954_v4, %v953_v49 }
 0x140   : > { %v957_v41 = vsel %vm3490_vm7, %v956_v13, %v955_v10 }
 0x141   : > { %v971_v48 = vsel %vm3489_vm0, %v957_v41, -inf }
 0x142   : > { %972 = vmax.xlane.f32.xlu1 %v971_v48 }
 0x17b   : > { %v967_v24 = vpop.xlane.xlu1 %966 }
 0x17c   : > { %v985_v40 = vrot.slane %v967_v24, 1  ;;  %v986_v11 = vrot.slane %v967_v24, 2  ;;  %v987_v63 = vrot.slane %v967_v24, 3  ;;  %v988_v0 = vrot.slane %v967_v24, 4 }
 0x17d   : > { %v2842_v2 = vsub.f32 %v2525_v52, %v967_v24  ;;  %v989_v31 = vrot.slane %v967_v24, 5  ;;  %v990_v56 = vrot.slane %v967_v24, 6  ;;  %v991_v37 = vrot.slane %v967_v24, 7 }
 0x17e   : > { %v2835_v55 = vsub.f32 %v2529_v46, %v985_v40  ;;  %v2838_v25 = vsub.f32 %v2533_v9, %v986_v11  ;;  %v2846_v1 = vsub.f32 %v2537_v3, %v987_v63  ;;  %v2849_v46 = vsub.f32 %v2551_v38, %v988_v0 }
 0x17f   : > { %v1086_v9 = vmul.f32 1.442695, %v2842_v2  ;;  %v2853_v61 = vsub.f32 %v2555_v5, %v989_v31  ;;  %v2856_v53 = vsub.f32 %v2559_v18, %v990_v56 }
 0x180   : > { %v1088_v42 = vmul.f32 1.442695, %v2835_v55  ;;  %v1090_v22 = vmul.f32 1.442695, %v2838_v25  ;;  %v1092_v52 = vmul.f32 1.442695, %v2846_v1 }
 0x181   : > { %v1094_v8 = vmul.f32 1.442695, %v2849_v46  ;;  %v1096_v3 = vmul.f32 1.442695, %v2853_v61  ;;  %v1098_v12 = vmul.f32 1.442695, %v2856_v53 }
 0x182   : > { %1992 = vpow2.f32 %v1088_v42 }
 0x183   : > { %1994 = vpow2.f32 %v1090_v22 }
 0x184   : > { %1996 = vpow2.f32 %v1086_v9 }
 0x185   : > { %1998 = vpow2.f32 %v1092_v52 }
 0x186   : > { %2000 = vpow2.f32 %v1094_v8 }
 0x187   : > { %2002 = vpow2.f32 %v1096_v3 }
 0x188   : > { %2004 = vpow2.f32 %v1098_v12 }
 0x18f   : > { %v1993_v5 = vpop.eup %1992 }
 0x190   : > { %v1180_v48 = vrot.slane %v1993_v5, 7 }
 0x197   : > { %v964_v38 = vpop.xlane.xlu0 %963 }
 0x198   : > { %v978_v34 = vrot.slane %v964_v38, 1  ;;  %v979_v18 = vrot.slane %v964_v38, 2  ;;  %v980_v33 = vrot.slane %v964_v38, 3  ;;  %v981_v17 = vrot.slane %v964_v38, 4 }
 0x199   : > { %v982_v7 = vrot.slane %v964_v38, 5  ;;  %v983_v54 = vrot.slane %v964_v38, 6  ;;  %v2863_v58 = vsub.f32 %v2612_v51, %v964_v38  ;;  %v984_v39 = vrot.slane %v964_v38, 7 }
 0x19a   : > { %v2866_v43 = vsub.f32 %v2617_v6, %v978_v34  ;;  %v2869_v4 = vsub.f32 %v2621_v32, %v979_v18  ;;  %v2872_v49 = vsub.f32 %v2625_v23, %v980_v33  ;;  %v2875_v10 = vsub.f32 %v2633_v44, %v981_v17  ;;  %v1995_v6 = vpop.eup %1994 }
 0x19b   : > { %v1070_v13 = vmul.f32 1.442695, %v2863_v58  ;;  %v2879_v41 = vsub.f32 %v2644_v47, %v982_v7  ;;  %v2882_v51 = vsub.f32 %v2655_v59, %v983_v54  ;;  %v2887_v23 = vsub.f32 %v2671_v57, %v984_v39  ;;  %v1997_v11 = vpop.eup %1996 }
 0x19c   : > { %v1072_v24 = vmul.f32 1.442695, %v2866_v43  ;;  %v1074_v32 = vmul.f32 1.442695, %v2869_v4  ;;  %v1076_v44 = vmul.f32 1.442695, %v2872_v49  ;;  %v2892_v47 = vsub.f32 %v2563_v19, %v991_v37  ;;  %v1999_v31 = vpop.eup %1998 }
 0x19d   : > { %2006 = vpow2.f32 %v1070_v13  ;;  %v1078_v40 = vmul.f32 1.442695, %v2875_v10  ;;  %v1080_v59 = vmul.f32 1.442695, %v2879_v41  ;;  %v1082_v42 = vmul.f32 1.442695, %v2882_v51  ;;  %v2001_v22 = vpop.eup %2000 }
 0x19e   : > { %2008 = vpow2.f32 %v1072_v24  ;;  %v1182_v63 = vrot.slane %v1995_v6, 6  ;;  %v1084_v57 = vmul.f32 1.442695, %v2887_v23  ;;  %v1181_v0 = vsel %vm3505_vm1, %v1180_v48, %v1997_v11  ;;  %v2003_v19 = vpop.eup %2002 }
 0x19f   : > { %2010 = vpow2.f32 %v1074_v32  ;;  %v1100_v56 = vmul.f32 1.442695, %v2892_v47  ;;  %v2005_v52 = vpop.eup %2004  ;;  %v1184_v8 = vrot.slane %v1999_v31, 5  ;;  %v1186_v12 = vrot.slane %v2001_v22, 4 }
 0x1a0   : > { %2012 = vpow2.f32 %v1076_v44  ;;  %v1183_v9 = vsel %vm3506_vm2, %v1182_v63, %v1181_v0  ;;  %v1188_v5 = vrot.slane %v2003_v19, 3  ;;  %v1190_v39 = vrot.slane %v2005_v52, 2 }
 0x1a1   : > { %2014 = vpow2.f32 %v1078_v40  ;;  %v1185_v3 = vsel %vm3508_vm3, %v1184_v8, %v1183_v9 }
 0x1a2   : > { %2016 = vpow2.f32 %v1080_v59  ;;  %v1187_v38 = vsel %vm3507_vm4, %v1186_v12, %v1185_v3 }
 0x1a3   : > { %2018 = vpow2.f32 %v1082_v42  ;;  %v1189_v17 = vsel %vm3492_vm5, %v1188_v5, %v1187_v38 }
 0x1a4   : > { %2020 = vpow2.f32 %v1084_v57  ;;  %v1191_v59 = vsel %vm3491_vm6, %v1190_v39, %v1189_v17 }
 0x1a5   : > { %2022 = vpow2.f32 %v1100_v56 }
 0x1aa   : > { %v2007_v37 = vpop.eup %2006 }
 0x1ab   : > { %v2009_v34 = vpop.eup %2008 }
 0x1ac   : > { %v2011_v18 = vpop.eup %2010  ;;  %v1166_v33 = vrot.slane %v2009_v34, 7 }
 0x1ad   : > { %v2013_v7 = vpop.eup %2012  ;;  %v1168_v54 = vrot.slane %v2011_v18, 6 }
 0x1ae   : > { %v2015_v13 = vpop.eup %2014  ;;  %v1167_v48 = vsel %vm3505_vm1, %v1166_v33, %v2007_v37  ;;  %v1170_v44 = vrot.slane %v2013_v7, 5 }
 0x1af   : > { %v2017_v6 = vpop.eup %2016  ;;  %v1169_v32 = vsel %vm3506_vm2, %v1168_v54, %v1167_v48  ;;  %v1172_v40 = vrot.slane %v2015_v13, 4 }
 0x1b0   : > { %v2019_v11 = vpop.eup %2018  ;;  %v1171_v22 = vsel %vm3508_vm3, %v1170_v44, %v1169_v32  ;;  %v1174_v19 = vrot.slane %v2017_v6, 3 }
 0x1b1   : > { %v2021_v31 = vpop.eup %2020  ;;  %v1176_v9 = vrot.slane %v2019_v11, 2  ;;  %v1173_v12 = vsel %vm3507_vm4, %v1172_v40, %v1171_v22 }
 0x1b2   : > { %v2023_v52 = vpop.eup %2022  ;;  %v1178_v38 = vrot.slane %v2021_v31, 1  ;;  %v1175_v5 = vsel %vm3492_vm5, %v1174_v19, %v1173_v12 }
 0x1b3   : > { %v970_v24 = vpop.xlane.xlu1 %969  ;;  %v1177_v18 = vsel %vm3491_vm6, %v1176_v9, %v1175_v5  ;;  %v1192_v7 = vrot.slane %v2023_v52, 1 }
 0x1b4   : > { %v992_v42 = vrot.slane %v970_v24, 1  ;;  %v993_v63 = vrot.slane %v970_v24, 2  ;;  %v994_v57 = vrot.slane %v970_v24, 3  ;;  %v995_v0 = vrot.slane %v970_v24, 4 }
 0x1b5   : > { %v2907_v56 = vsub.f32 %v2698_v28, %v970_v24  ;;  %v996_v28 = vrot.slane %v970_v24, 5  ;;  %v997_v34 = vrot.slane %v970_v24, 6  ;;  %v998_v33 = vrot.slane %v970_v24, 7 }
 0x1b6   : > { %v2911_v8 = vsub.f32 %v2702_v29, %v992_v42  ;;  %v2914_v3 = vsub.f32 %v2709_v16, %v993_v63  ;;  %v2921_v17 = vsub.f32 %v2718_v30, %v994_v57  ;;  %v2924_v29 = vsub.f32 %v2722_v50, %v995_v0 }
 0x1b7   : > { %v1102_v37 = vmul.f32 1.442695, %v2907_v56  ;;  %v1179_v16 = vsel %vm3490_vm7, %v1178_v38, %v1177_v18  ;;  %v2928_v54 = vsub.f32 %v2726_v35, %v996_v28  ;;  %v2931_v39 = vsub.f32 %v2736_v20, %v997_v34 }
 0x1b8   : > { %3554 = vst [vmem:[#allocation11_spill] sm:$0xff] %v2924_v29  ;;  %v1226_v13 = vsel %vm3489_vm0, %v1179_v16, 0.0  ;;  %v2935_v48 = vsub.f32 %v2759_v26, %v998_v33  ;;  %v1104_v30 = vmul.f32 1.442695, %v2911_v8  ;;  %v1106_v6 = vmul.f32 1.442695, %v2914_v3 }
 0x1b9   : > { %3555 = vst [vmem:[#allocation12_spill] sm:$0xff] %v2928_v54  ;;  %3556 = vst [vmem:[#allocation13_spill] sm:$0xff] %v2931_v39  ;;  %2024 = vpow2.f32 %v1102_v37  ;;  %1227 = vadd.xlane.f32.xlu1 %v1226_v13  ;;  %v1193_v50 = vsel %vm3490_vm7, %v1192_v7, %v1191_v59  ;;  %v1108_v24 = vmul.f32 1.442695, %v2921_v17  ;;  %v1110_v35 = vmul.f32 1.442695, %v2924_v29 }
 0x1ba   : > { %3557 = vst [vmem:[#allocation14_spill] sm:$0xff] %v2935_v48  ;;  %2026 = vpow2.f32 %v1104_v30  ;;  %v1112_v20 = vmul.f32 1.442695, %v2928_v54  ;;  %v1114_v32 = vmul.f32 1.442695, %v2931_v39  ;;  %v1229_v26 = vsel %vm3489_vm0, %v1193_v50, 0.0 }
 0x1bb   : > { %2028 = vpow2.f32 %v1106_v6  ;;  %v1116_v44 = vmul.f32 1.442695, %v2935_v48  ;;  %v3119_v29 = vld [vmem:[%s2998_s26 + $0x6] sm:$0x3] }
 0x1bc   : > { %2030 = vpow2.f32 %v1108_v24 }
 0x1bd   : > { %1230 = vadd.xlane.f32.xlu1 %v1229_v26  ;;  %2032 = vpow2.f32 %v1110_v35 }
 0x1be   : > { %2034 = vpow2.f32 %v1112_v20 }
 0x1bf   : > { %2036 = vpow2.f32 %v1114_v32 }
 0x1c0   : > { %2038 = vpow2.f32 %v1116_v44 }
 0x1c6   : > { %v2025_v40 = vpop.eup %2024 }
 0x1c7   : > { %v2027_v59 = vpop.eup %2026 }
 0x1c8   : > { %v2029_v11 = vpop.eup %2028  ;;  %v1194_v42 = vrot.slane %v2027_v59, 7 }
 0x1c9   : > { %v2031_v63 = vpop.eup %2030  ;;  %v1196_v0 = vrot.slane %v2029_v11, 6 }
 0x1ca   : > { %v2033_v31 = vpop.eup %2032  ;;  %v1195_v37 = vsel %vm3505_vm1, %v1194_v42, %v2025_v40  ;;  %v1198_v5 = vrot.slane %v2031_v63, 5 }
 0x1cb   : > { %v973_v57 = vpop.xlane.xlu1 %972  ;;  %v2035_v52 = vpop.eup %2034  ;;  %v1197_v33 = vsel %vm3506_vm2, %v1196_v0, %v1195_v37  ;;  %v1200_v16 = vrot.slane %v2033_v31, 4 }
 0x1cc   : > { %v999_v22 = vrot.slane %v973_v57, 1  ;;  %v1000_v19 = vrot.slane %v973_v57, 2  ;;  %v1001_v9 = vrot.slane %v973_v57, 3  ;;  %v1002_v12 = vrot.slane %v973_v57, 4  ;;  %v2037_v28 = vpop.eup %2036 }
 0x1cd   : > { %v2947_v38 = vsub.f32 %v2797_v21, %v973_v57  ;;  %v2039_v7 = vpop.eup %2038  ;;  %v1199_v30 = vsel %vm3508_vm3, %v1198_v5, %v1197_v33  ;;  %v1202_v21 = vrot.slane %v2035_v52, 3  ;;  %v1003_v6 = vrot.slane %v973_v57, 5 }
 0x1ce   : > { %v2951_v34 = vsub.f32 %v2788_v27, %v999_v22  ;;  %v2954_v18 = vsub.f32 %v2794_v15, %v1000_v19  ;;  %v1201_v50 = vsel %vm3507_vm4, %v1200_v16, %v1199_v30  ;;  %v1204_v24 = vrot.slane %v2037_v28, 2 }
 0x1cf   : > { %3558 = vst [vmem:[#allocation15_spill] sm:$0xff] %v2947_v38  ;;  %v1118_v13 = vmul.f32 1.442695, %v2947_v38  ;;  %v1004_v35 = vrot.slane %v973_v57, 6  ;;  %v1005_v20 = vrot.slane %v973_v57, 7  ;;  %v1203_v27 = vsel %vm3492_vm5, %v1202_v21, %v1201_v50 }
 0x1d0   : > { %3559 = vst [vmem:[#allocation16_spill] sm:$0xff] %v2951_v34  ;;  %3560 = vst [vmem:[#allocation17_spill] sm:$0xff] %v2954_v18  ;;  %v1206_v32 = vrot.slane %v2039_v7, 1  ;;  %v2962_v15 = vsub.f32 %v2801_v45, %v1001_v9  ;;  %v2965_v26 = vsub.f32 %v2807_v60, %v1002_v12  ;;  %v1205_v44 = vsel %vm3491_vm6, %v1204_v24, %v1203_v27 }
 0x1d1   : > { %v2969_v40 = vsub.f32 %v2811_v36, %v1003_v6  ;;  %v2972_v59 = vsub.f32 %v2818_v62, %v1004_v35  ;;  %v2975_v11 = vsub.f32 %v2827_v14, %v1005_v20  ;;  %v1120_v63 = vmul.f32 1.442695, %v2951_v34 }
 0x1d2   : > { %3561 = vst [vmem:[#allocation18_spill] sm:$0xff] %v2962_v15  ;;  %3562 = vst [vmem:[#allocation19_spill] sm:$0xff] %v2965_v26  ;;  %v1207_v42 = vsel %vm3490_vm7, %v1206_v32, %v1205_v44  ;;  %v1122_v45 = vmul.f32 1.442695, %v2954_v18  ;;  %v1124_v60 = vmul.f32 1.442695, %v2962_v15  ;;  %2040 = vpow2.f32 %v1118_v13 }
 0x1d3   : > { %3563 = vst [vmem:[#allocation20_spill] sm:$0xff] %v2969_v40  ;;  %3564 = vst [vmem:[#allocation21_spill] sm:$0xff] %v2972_v59  ;;  %v1232_v57 = vsel %vm3489_vm0, %v1207_v42, 0.0  ;;  %v1126_v36 = vmul.f32 1.442695, %v2965_v26  ;;  %2042 = vpow2.f32 %v1120_v63  ;;  %v3566_v63 = vmov 0  }
 0x1d4   : > { %3565 = vst [vmem:[#allocation22_spill] sm:$0xff] %v2975_v11  ;;  %1233 = vadd.xlane.f32.xlu1 %v1232_v57  ;;  %v1128_v62 = vmul.f32 1.442695, %v2969_v40  ;;  %2044 = vpow2.f32 %v1122_v45  ;;  %v1130_v14 = vmul.f32 1.442695, %v2972_v59 }
 0x1d5   : > { %2046 = vpow2.f32 %v1124_v60  ;;  %v1132_v0 = vmul.f32 1.442695, %v2975_v11  ;;  %v1342_v42 = vld [vmem:[%s2998_s26] sm:$0x3]  ;;  %v1343_v60 = vld [vmem:[%s2998_s26 + $0x2] sm:$0x3] }
 0x1d6   : > { %2048 = vpow2.f32 %v1126_v36  ;;  %vm1346_vm8 = vnez %v1342_v42  ;;  %vm1347_vm9 = vnez %v1343_v60 }
 0x1d7   : > { %2050 = vpow2.f32 %v1128_v62  ;;  %v1350_v45 = vsel %vm1346_vm8, 16843009, %v3566_v63 }
 0x1d8   : > { %2052 = vpow2.f32 %v1130_v14  ;;  %v1355_v57 = vshrl.u32 %v1350_v45, 8  ;;  %v1357_v36 = vshrl.u32 %v1350_v45, 16  ;;  %v1359_v62 = vshrl.u32 %v1350_v45, 24 }
 0x1d9   : > { %2054 = vpow2.f32 %v1132_v0  ;;  %v1361_v14 = vrot.slane %v1350_v45, 1  ;;  %vm1398_vm10 = vnez %v1350_v45 }
 0x1da   : > { %v1362_v0 = vrot.slane %v1355_v57, 1  ;;  %vm1399_vm11 = vnez %v1355_v57  ;;  %vm1400_vm12 = vnez %v1357_v36  ;;  %vm1401_vm13 = vnez %v1359_v62 }
 0x1db   : > { %vm1402_vm14 = vnez %v1361_v14 }
 0x1dc   : > { %vm1403_vm15 = vnez %v1362_v0 }
 0x1df   : > { %v2041_v31 = vpop.eup %2040 }
 0x1e0   : > { %v2043_v22 = vpop.eup %2042 }
 0x1e1   : > { %v2045_v19 = vpop.eup %2044  ;;  %v1208_v9 = vrot.slane %v2043_v22, 7  ;;  %v1364_v22 = vrot.slane %v1359_v62, 1 }
 0x1e2   : > { %v2047_v52 = vpop.eup %2046  ;;  %v1210_v12 = vrot.slane %v2045_v19, 6  ;;  %v1351_v19 = vsel %vm1347_vm9, 16843009, %v3566_v63 }
 0x1e3   : > { %v2049_v37 = vpop.eup %2048  ;;  %v1209_v5 = vsel %vm3505_vm1, %v1208_v9, %v2041_v31  ;;  %v1212_v28 = vrot.slane %v2047_v52, 5  ;;  %v1363_v31 = vrot.slane %v1357_v36, 1  ;;  %v1430_v9 = vsel %vm1398_vm10, 16843009, %v3566_v63 }
 0x1e4   : > { %v2051_v33 = vpop.eup %2050  ;;  %v1211_v16 = vsel %vm3506_vm2, %v1210_v12, %v1209_v5  ;;  %v1214_v7 = vrot.slane %v2049_v37, 4  ;;  %v1366_v52 = vshrl.u32 %v1351_v19, 8  ;;  %vm1405_vm8 = vnez %v1364_v22 }
 0x1e5   : > { %v2053_v13 = vpop.eup %2052  ;;  %v1213_v30 = vsel %vm3508_vm3, %v1212_v28, %v1211_v16  ;;  %v1216_v21 = vrot.slane %v2051_v33, 3  ;;  %v1431_v12 = vsel %vm1399_vm11, 16843009, %v3566_v63  ;;  %v1368_v5 = vshrl.u32 %v1351_v19, 16 }
 0x1e6   : > { %v2055_v6 = vpop.eup %2054  ;;  %v1215_v50 = vsel %vm3507_vm4, %v1214_v7, %v1213_v30  ;;  %v1218_v24 = vrot.slane %v2053_v13, 2  ;;  %v1370_v28 = vshrl.u32 %v1351_v19, 24  ;;  %v1432_v33 = vsel %vm1400_vm12, 16843009, %v3566_v63  ;;  %v1344_v7 = vld [vmem:[%s2998_s26 + $0x4] sm:$0x3] }
 0x1e7   : > { %v1217_v35 = vsel %vm3492_vm5, %v1216_v21, %v1215_v50  ;;  %v1220_v20 = vrot.slane %v2055_v6, 1  ;;  %v1433_v16 = vsel %vm1401_vm13, 16843009, %v3566_v63  ;;  %v1434_v13 = vsel %vm1402_vm14, 16843009, %v3566_v63 }
 0x1e8   : > { %v1219_v27 = vsel %vm3491_vm6, %v1218_v24, %v1217_v35  ;;  %v1435_v30 = vsel %vm1403_vm15, 16843009, %v3566_v63  ;;  %v1462_v6 = vunpack.c.0.s8 %v1430_v9  ;;  %v1437_v50 = vsel %vm1405_vm8, 16843009, %v3566_v63 }
 0x1e9   : > { %v1221_v32 = vsel %vm3490_vm7, %v1220_v20, %v1219_v27  ;;  %v1463_v24 = vunpack.c.0.s8 %v1431_v12  ;;  %v1372_v35 = vrot.slane %v1351_v19, 1  ;;  %v1373_v20 = vrot.slane %v1366_v52, 1 }
 0x1ea   : > { %v1235_v44 = vsel %vm3489_vm0, %v1221_v32, 0.0  ;;  %vm1404_vm0 = vnez %v1363_v31  ;;  %v1374_v27 = vrot.slane %v1368_v5, 1  ;;  %v1375_v32 = vrot.slane %v1370_v28, 1 }
 0x1eb   : > { %1236 = vadd.xlane.f32.xlu1 %v1235_v44  ;;  %v1436_v21 = vsel %vm1404_vm0, 16843009, %v3566_v63  ;;  %vm1406_vm9 = vnez %v1351_v19  ;;  %vm1348_vm10 = vnez %v1344_v7  ;;  %v1464_v44 = vunpack.c.0.s8 %v1432_v33 }
 0x1ec   : > { %v1465_v42 = vunpack.c.0.s8 %v1433_v16  ;;  %v1466_v45 = vunpack.c.0.s8 %v1434_v13  ;;  %v1467_v60 = vunpack.c.0.s8 %v1435_v30  ;;  %v1468_v57 = vunpack.c.0.s8 %v1436_v21 }
 0x1ed   : > { %vm1407_vm11 = vnez %v1366_v52  ;;  %vm1408_vm12 = vnez %v1368_v5  ;;  %vm1409_vm13 = vnez %v1370_v28  ;;  %vm3015_vm0 = vnez %v1372_v35 }
 0x1ee   : > { %vm1411_vm14 = vnez %v1373_v20  ;;  %v3020_v14 = vsel %vm1406_vm9, 16843009, %v3566_v63  ;;  %v3023_v0 = vsel %vm1348_vm10, 16843009, %v3566_v63  ;;  %v1469_v31 = vunpack.c.0.s8 %v1437_v50 }
 0x1ef   : > { %v3026_v22 = vstv %s3005_s11  ;;  %vm1412_vm15 = vnez %v1374_v27  ;;  %vm1413_vm8 = vnez %v1375_v32  ;;  %vm3028_vm7 = vcmp.ne.s32.totalorder %v1462_v6, 0 }
 0x1f0   : > { %v1439_v9 = vsel %vm1407_vm11, 16843009, %v3566_v63  ;;  %v1440_v52 = vsel %vm1408_vm12, 16843009, %v3566_v63  ;;  %v3035_v12 = vsel %vm1409_vm13, 16843009, %v3566_v63  ;;  %v1470_v7 = vunpack.c.0.s8 %v3020_v14 }
 0x1f1   : > { %vm3037_vm9 = vcmp.ne.s32.totalorder %v1463_v24, 0  ;;  %vm3041_vm10 = vcmp.ne.s32.totalorder %v1464_v44, 0  ;;  %vm3045_vm6 = vcmp.ne.s32.totalorder %v1465_v42, 0  ;;  %v3052_v33 = vsel %vm3015_vm0, 16843009, %v3566_v63 }
 0x1f2   : > { %v3056_v16 = vsel %vm1411_vm14, 16843009, %v3566_v63  ;;  %v1377_v13 = vshrl.u32 %v3023_v0, 8  ;;  %vm3060_vm11 = vcmp.ne.s32.totalorder %v1466_v45, 0  ;;  %vm3064_vm12 = vcmp.ne.s32.totalorder %v1467_v60, 0 }
 0x1f3   : > { %vm3068_vm13 = vcmp.ne.s32.totalorder %v1468_v57, 0  ;;  %v1444_v50 = vsel %vm1412_vm15, 16843009, %v3566_v63  ;;  %v3076_v24 = vsel %vm1413_vm8, 16843009, %v3566_v63  ;;  %v1379_v35 = vshrl.u32 %v3023_v0, 16 }
 0x1f4   : > { %v1381_v20 = vshrl.u32 %v3023_v0, 24  ;;  %vm3080_vm0 = vcmp.ne.s32.totalorder %v1469_v31, 0  ;;  %v1471_v42 = vunpack.c.0.s8 %v1439_v9  ;;  %v1472_v45 = vunpack.c.0.s8 %v1440_v52 }
 0x1f5   : > { %v1473_v60 = vunpack.c.0.s8 %v3035_v12  ;;  %vm1414_vm14 = vnez %v3023_v0  ;;  %v1474_v27 = vunpack.c.0.s8 %v3052_v33  ;;  %vm1415_vm15 = vnez %v1377_v13 }
 0x1f6   : > { %vm1416_vm5 = vnez %v1379_v35  ;;  %vm1417_vm8 = vnez %v1381_v20  ;;  %v1475_v57 = vunpack.c.0.s8 %v3056_v16  ;;  %v1383_v62 = vrot.slane %v3023_v0, 1 }
 0x1f7   : > { %v3089_v14 = vrot.slane %v1377_v13, 1  ;;  %v3091_v9 = vrot.slane %v1379_v35, 1  ;;  %v3093_v52 = vrot.slane %v1381_v20, 1  ;;  %v3096_v12 = vsel %vm1414_vm14, 16843009, %v3566_v63 }
 0x1f8   : > { %v1477_v33 = vunpack.c.0.s8 %v3076_v24  ;;  %v3100_v11 = vsel %vm1415_vm15, 16843009, %v3566_v63  ;;  %v3103_v16 = vsel %vm1416_vm5, 16843009, %v3566_v63  ;;  %v3106_v0 = vsel %vm1417_vm8, 16843009, %v3566_v63 }
 0x1f9   : > { %vm3128_vm5 = vcmp.ne.s32.totalorder %v1470_v7, 0  ;;  %vm3132_vm14 = vcmp.ne.s32.totalorder %v1471_v42, 0  ;;  %vm1419_vm15 = vnez %v3089_v14  ;;  %vm1420_vm8 = vnez %v3091_v9 }
 0x1fa   : > { %v1451_v21 = vsel %vm1419_vm15, 16843009, %v3566_v63  ;;  %v1479_v9 = vunpack.c.0.s8 %v3100_v11 }
 0x242   : > { %v1228_v37 = vpop.xlane.xlu1 %1227 }
 0x243   : > { %2056 = vlog2.f32 %v1228_v37 }
 0x246   : > { %v1231_v36 = vpop.xlane.xlu1 %1230 }
 0x247   : > { %2058 = vlog2.f32 %v1231_v36  ;;  %v1476_v36 = vunpack.c.0.s8 %v1444_v50 }
 0x250   : > { %v2057_v32 = vpop.eup %2056 }
 0x251   : > { %v1239_v31 = vmul.f32 0.6931472, %v2057_v32 }
 0x253   : > { %v1250_v13 = vrot.slane %v1239_v31, 1  ;;  %v1251_v50 = vrot.slane %v1239_v31, 2  ;;  %v1252_v35 = vrot.slane %v1239_v31, 3  ;;  %v1253_v20 = vrot.slane %v1239_v31, 4 }
 0x254   : > { %v1254_v32 = vrot.slane %v1239_v31, 5  ;;  %v1255_v59 = vrot.slane %v1239_v31, 6  ;;  %v1256_v40 = vrot.slane %v1239_v31, 7  ;;  %v1310_v26 = vsub.f32 %v2863_v58, %v1239_v31 }
 0x255   : > { %v1311_v24 = vsub.f32 %v2866_v43, %v1250_v13  ;;  %v1312_v15 = vsub.f32 %v2869_v4, %v1251_v50  ;;  %v1313_v18 = vsub.f32 %v2872_v49, %v1252_v35  ;;  %v1314_v34 = vsub.f32 %v2875_v10, %v1253_v20 }
 0x256   : > { %v1315_v38 = vsub.f32 %v2879_v41, %v1254_v32  ;;  %v1316_v48 = vsub.f32 %v2882_v51, %v1255_v59  ;;  %v1317_v39 = vsub.f32 %v2887_v23, %v1256_v40  ;;  %v1526_v54 = vsel %vm3028_vm7, -1e+08, %v1310_v26  ;;  %v2059_v23 = vpop.eup %2058 }
 0x257   : > { %v1527_v58 = vsel %vm3037_vm9, -1e+08, %v1311_v24  ;;  %v1528_v43 = vsel %vm3041_vm10, -1e+08, %v1312_v15  ;;  %v1529_v4 = vsel %vm3045_vm6, -1e+08, %v1313_v18  ;;  %v1559_v49 = vmul.f32 %v3026_v22, %v1526_v54 }
 0x258   : > { %vm3136_vm7 = vcmp.ne.s32.totalorder %v1472_v45, 0  ;;  %v1530_v15 = vsel %vm3060_vm11, -1e+08, %v1314_v34  ;;  %v1531_v18 = vsel %vm3064_vm12, -1e+08, %v1315_v38  ;;  %v1560_v26 = vmul.f32 %v3026_v22, %v1527_v58 }
 0x259   : > { %v1532_v54 = vsel %vm3068_vm13, -1e+08, %v1316_v48  ;;  %vm3147_vm6 = vcmp.ne.s32.totalorder %v1473_v60, 0  ;;  %vm3151_vm9 = vcmp.ne.s32.totalorder %v1474_v27, 0  ;;  %vm3155_vm10 = vcmp.ne.s32.totalorder %v1475_v57, 0 }
 0x25a   : > { %v1533_v38 = vsel %vm3080_vm0, -1e+08, %v1317_v39  ;;  %v1561_v34 = vmul.f32 %v3026_v22, %v1528_v43  ;;  %v1562_v48 = vmul.f32 %v3026_v22, %v1529_v4  ;;  %v1563_v37 = vmul.f32 %v3026_v22, %v1530_v15 }
 0x25b   : > { %vm3164_vm11 = vcmp.ne.s32.totalorder %v1476_v36, 0  ;;  %vm1349_vm12 = vnez %v3119_v29  ;;  %v1564_v28 = vmul.f32 %v3026_v22, %v1531_v18  ;;  %v1565_v7 = vmul.f32 %v3026_v22, %v1532_v54 }
 0x25c   : > { %v1566_v30 = vmul.f32 %v3026_v22, %v1533_v38  ;;  %v1623_v39 = vrot.slane %v1560_v26, 7  ;;  %vm3172_vm13 = vcmp.ne.s32.totalorder %v1477_v33, 0  ;;  %v1625_v6 = vrot.slane %v1561_v34, 6 }
 0x25d   : > { %v1627_v44 = vrot.slane %v1562_v48, 5  ;;  %v1629_v42 = vrot.slane %v1563_v37, 4  ;;  %v1241_v45 = vmul.f32 0.6931472, %v2059_v23  ;;  %v1631_v27 = vrot.slane %v1564_v28, 3 }
 0x25e   : > { %v1624_v60 = vsel %vm3505_vm1, %v1623_v39, %v1559_v49  ;;  %v1633_v57 = vrot.slane %v1565_v7, 2  ;;  %v1635_v36 = vrot.slane %v1566_v30, 1  ;;  %vm3177_vm0 = vnez %v1383_v62 }
 0x25f   : > { %v1626_v33 = vsel %vm3506_vm2, %v1625_v6, %v1624_v60  ;;  %v1257_v13 = vrot.slane %v1241_v45, 1  ;;  %v1258_v50 = vrot.slane %v1241_v45, 2  ;;  %v1259_v35 = vrot.slane %v1241_v45, 3 }
 0x260   : > { %v1628_v20 = vsel %vm3508_vm3, %v1627_v44, %v1626_v33  ;;  %v1260_v32 = vrot.slane %v1241_v45, 4  ;;  %v1261_v24 = vrot.slane %v1241_v45, 5  ;;  %v1262_v58 = vrot.slane %v1241_v45, 6 }
 0x261   : > { %v1630_v62 = vsel %vm3507_vm4, %v1629_v42, %v1628_v20  ;;  %v1263_v43 = vrot.slane %v1241_v45, 7  ;;  %v1318_v4 = vsub.f32 %v2842_v2, %v1241_v45  ;;  %v1319_v49 = vsub.f32 %v2835_v55, %v1257_v13 }
 0x262   : > { %vm3603_vm1 = vcmask 1045509   ;;  %v1320_v15 = vsub.f32 %v2838_v25, %v1258_v50  ;;  %v1321_v18 = vsub.f32 %v2846_v1, %v1259_v35  ;;  %v1322_v54 = vsub.f32 %v2849_v46, %v1260_v32 }
 0x263   : > { %v1632_v23 = vsel %vm3603_vm1, %v1631_v27, %v1630_v62  ;;  %vm3604_vm2 = vcmask 1046534   ;;  %v1323_v38 = vsub.f32 %v2853_v61, %v1261_v24  ;;  %v1324_v34 = vsub.f32 %v2856_v53, %v1262_v58 }
 0x264   : > { %v1634_v26 = vsel %vm3604_vm2, %v1633_v57, %v1632_v23  ;;  %v1325_v48 = vsub.f32 %v2892_v47, %v1263_v43  ;;  %vm3605_vm4 = vcmask 1047559   ;;  %v1534_v55 = vsel %vm3128_vm5, -1e+08, %v1318_v4  ;;  %v1234_v47 = vpop.xlane.xlu1 %1233 }
 0x265   : > { %v1636_v2 = vsel %vm3605_vm4, %v1635_v36, %v1634_v26  ;;  %v1535_v25 = vsel %vm3132_vm14, -1e+08, %v1319_v49  ;;  %v1536_v1 = vsel %vm3136_vm7, -1e+08, %v1320_v15  ;;  %vm3606_vm1 = vcmask 605184  }
 0x266   : > { %1683 = vst.msk [vmem:[%s3204_s8] sm:$0xff] %vm3606_vm1, %v1636_v2  ;;  %v1537_v46 = vsel %vm3147_vm6, -1e+08, %v1321_v18  ;;  %v1538_v61 = vsel %vm3151_vm9, -1e+08, %v1322_v54  ;;  %vm1421_vm2 = vnez %v3093_v52  ;;  %v1568_v41 = vmul.f32 %v3026_v22, %v1535_v25 }
 0x267   : > { %v1539_v53 = vsel %vm3155_vm10, -1e+08, %v1323_v38  ;;  %v1540_v10 = vsel %vm3164_vm11, -1e+08, %v1324_v34  ;;  %v1569_v51 = vmul.f32 %v3026_v22, %v1536_v1  ;;  %v1353_v40 = vsel %vm1349_vm12, 16843009, %v3566_v63  ;;  %vm3613_vm11 = vmmov %vm3606_vm1 }
 0x268   : > { %v1541_v59 = vsel %vm3172_vm13, -1e+08, %v1325_v48  ;;  %v1567_v19 = vmul.f32 %v3026_v22, %v1534_v55  ;;  %v1570_v37 = vmul.f32 %v3026_v22, %v1537_v46  ;;  %v1571_v28 = vmul.f32 %v3026_v22, %v1538_v61 }
 0x269   : > { %v1572_v5 = vmul.f32 %v3026_v22, %v1539_v53  ;;  %v1637_v7 = vrot.slane %v1568_v41, 7  ;;  %v1639_v30 = vrot.slane %v1569_v51, 6  ;;  %2060 = vlog2.f32 %v1234_v47 }
 0x26a   : > { %v1573_v39 = vmul.f32 %v3026_v22, %v1540_v10  ;;  %v1450_v29 = vsel %vm3177_vm0, 16843009, %v3566_v63  ;;  %v1478_v6 = vunpack.c.0.s8 %v3096_v12  ;;  %v1574_v44 = vmul.f32 %v3026_v22, %v1541_v59 }
 0x26b   : > { %vm3607_vm4 = vcmask 1041409   ;;  %v1641_v45 = vrot.slane %v1570_v37, 5  ;;  %v1452_v60 = vsel %vm1420_vm8, 16843009, %v3566_v63  ;;  %vm3608_vm5 = vcmask 1042434  }
 0x26c   : > { %v1638_v42 = vsel %vm3607_vm4, %v1637_v7, %v1567_v19  ;;  %v1643_v57 = vrot.slane %v1571_v28, 4  ;;  %v1453_v36 = vsel %vm1421_vm2, 16843009, %v3566_v63  ;;  %v1388_v14 = vshrl.u32 %v1353_v40, 8 }
 0x26d   : > { %v1640_v27 = vsel %vm3608_vm5, %v1639_v30, %v1638_v42  ;;  %v1645_v12 = vrot.slane %v1572_v5, 3  ;;  %v1390_v33 = vshrl.u32 %v1353_v40, 16  ;;  %v1392_v13 = vshrl.u32 %v1353_v40, 24 }
 0x26e   : > { %v1642_v31 = vsel %vm3508_vm3, %v1641_v45, %v1640_v27  ;;  %vm3609_vm14 = vcmask 1044484   ;;  %v1647_v35 = vrot.slane %v1573_v39, 2  ;;  %v1480_v20 = vunpack.c.0.s8 %v3103_v16  ;;  %v3630_v45 = vld [vmem:[#allocation11_spill] sm:$0xff]  ;;  %v3631_v27 = vld [vmem:[#allocation12_spill] sm:$0xff] }
 0x26f   : > { %v1644_v50 = vsel %vm3609_vm14, %v1643_v57, %v1642_v31  ;;  %vm3610_vm7 = vcmask 1045509   ;;  %v1649_v24 = vrot.slane %v1574_v44, 1  ;;  %v1481_v52 = vunpack.c.0.s8 %v3106_v0  ;;  %v3632_v57 = vld [vmem:[#allocation13_spill] sm:$0xff] }
 0x270   : > { %v1646_v32 = vsel %vm3610_vm7, %v1645_v12, %v1644_v50  ;;  %v1482_v58 = vunpack.c.0.s8 %v1450_v29  ;;  %vm3611_vm6 = vcmask 1046534   ;;  %v1483_v43 = vunpack.c.0.s8 %v1451_v21 }
 0x271   : > { %v1648_v62 = vsel %vm3611_vm6, %v1647_v35, %v1646_v32  ;;  %v1394_v4 = vrot.slane %v1353_v40, 1  ;;  %vm1422_vm9 = vnez %v1353_v40  ;;  %vm3612_vm10 = vcmask 1047559  }
 0x272   : > { %v1650_v49 = vsel %vm3612_vm10, %v1649_v24, %v1648_v62  ;;  %v1395_v23 = vrot.slane %v1388_v14, 1  ;;  %v1396_v15 = vrot.slane %v1390_v33, 1  ;;  %v1397_v18 = vrot.slane %v1392_v13, 1 }
 0x273   : > { %1684 = vst.msk [vmem:[%s3204_s8 + $0x8] sm:$0xff] %vm3613_vm11, %v1650_v49  ;;  %v1484_v11 = vunpack.c.0.s8 %v1452_v60  ;;  %v1485_v16 = vunpack.c.0.s8 %v1453_v36  ;;  %vm3255_vm12 = vcmp.ne.s32.totalorder %v1478_v6, 0  ;;  %vm3259_vm13 = vcmp.ne.s32.totalorder %v1479_v9, 0 }
 0x274   : > { %vm3263_vm0 = vcmp.ne.s32.totalorder %v1480_v20, 0  ;;  %vm3267_vm15 = vcmp.ne.s32.totalorder %v1481_v52, 0  ;;  %vm1423_vm8 = vnez %v1388_v14  ;;  %vm1424_vm1 = vnez %v1390_v33  ;;  %v1237_v51 = vpop.xlane.xlu1 %1236  ;;  %v3633_v14 = vld [vmem:[#allocation14_spill] sm:$0xff] }
 0x275   : > { %vm3271_vm2 = vcmp.ne.s32.totalorder %v1482_v58, 0  ;;  %vm1425_vm4 = vnez %v1392_v13  ;;  %vm1426_vm5 = vnez %v1394_v4  ;;  %v3277_v48 = vsel %vm1422_vm9, 16843009, %v3566_v63 }
 0x276   : > { %vm3279_vm14 = vcmp.ne.s32.totalorder %v1483_v43, 0  ;;  %vm1427_vm7 = vnez %v1395_v23  ;;  %vm1428_vm6 = vnez %v1396_v15  ;;  %vm1429_vm10 = vnez %v1397_v18  ;;  %v2061_v55 = vpop.eup %2060 }
 0x277   : > { %vm3283_vm11 = vcmp.ne.s32.totalorder %v1484_v11, 0  ;;  %vm3287_vm3 = vcmp.ne.s32.totalorder %v1485_v16, 0  ;;  %v1455_v46 = vsel %vm1423_vm8, 16843009, %v3566_v63  ;;  %v1456_v61 = vsel %vm1424_vm1, 16843009, %v3566_v63 }
 0x278   : > { %v1243_v53 = vmul.f32 0.6931472, %v2061_v55  ;;  %v1457_v47 = vsel %vm1425_vm4, 16843009, %v3566_v63  ;;  %v1458_v10 = vsel %vm1426_vm5, 16843009, %v3566_v63  ;;  %v1486_v41 = vunpack.c.0.s8 %v3277_v48 }
 0x279   : > { %v3297_v40 = vsel %vm1427_vm7, 16843009, %v3566_v63  ;;  %v1460_v59 = vsel %vm1428_vm6, 16843009, %v3566_v63  ;;  %v1461_v19 = vsel %vm1429_vm10, 16843009, %v3566_v63  ;;  %2062 = vlog2.f32 %v1237_v51 }
 0x27a   : > { %v1264_v37 = vrot.slane %v1243_v53, 1  ;;  %v1265_v28 = vrot.slane %v1243_v53, 2  ;;  %v1266_v5 = vrot.slane %v1243_v53, 3  ;;  %v1267_v7 = vrot.slane %v1243_v53, 4 }
 0x27b   : > { %v1268_v30 = vrot.slane %v1243_v53, 5  ;;  %v1269_v39 = vrot.slane %v1243_v53, 6  ;;  %v1270_v29 = vrot.slane %v1243_v53, 7  ;;  %v1326_v21 = vsub.f32 %v2907_v56, %v1243_v53 }
 0x27c   : > { %v1327_v6 = vsub.f32 %v2911_v8, %v1264_v37  ;;  %v1328_v44 = vsub.f32 %v2914_v3, %v1265_v28  ;;  %v1329_v42 = vsub.f32 %v2921_v17, %v1266_v5  ;;  %v1330_v60 = vsub.f32 %v3630_v45, %v1267_v7 }
 0x27d   : > { %v1331_v63 = vsub.f32 %v3631_v27, %v1268_v30  ;;  %v1332_v36 = vsub.f32 %v3632_v57, %v1269_v39  ;;  %v1333_v31 = vsub.f32 %v3633_v14, %v1270_v29  ;;  %v1542_v12 = vsel %vm3255_vm12, -1e+08, %v1326_v21 }
 0x27e   : > { %v1543_v56 = vsel %vm3259_vm13, -1e+08, %v1327_v6  ;;  %v1544_v8 = vsel %vm3263_vm0, -1e+08, %v1328_v44  ;;  %v1545_v3 = vsel %vm3267_vm15, -1e+08, %v1329_v42  ;;  %v1487_v17 = vunpack.c.0.s8 %v1455_v46 }
 0x27f   : > { %v1546_v33 = vsel %vm3271_vm2, -1e+08, %v1330_v60  ;;  %v1547_v13 = vsel %vm3279_vm14, -1e+08, %v1331_v63  ;;  %v1548_v50 = vsel %vm3283_vm11, -1e+08, %v1332_v36  ;;  %v1576_v35 = vmul.f32 %v3026_v22, %v1543_v56 }
 0x280   : > { %v1549_v9 = vsel %vm3287_vm3, -1e+08, %v1333_v31  ;;  %v1577_v20 = vmul.f32 %v3026_v22, %v1544_v8  ;;  %v1578_v32 = vmul.f32 %v3026_v22, %v1545_v3  ;;  %v1579_v24 = vmul.f32 %v3026_v22, %v1546_v33  ;;  %v3658_v42 = vld [vmem:[#allocation15_spill] sm:$0xff]  ;;  %v3659_v60 = vld [vmem:[#allocation16_spill] sm:$0xff]  ;;  %v3660_v63 = vld [vmem:[#allocation17_spill] sm:$0xff] }
 0x281   : > { %v1575_v52 = vmul.f32 %v3026_v22, %v1542_v12  ;;  %v1580_v58 = vmul.f32 %v3026_v22, %v1547_v13  ;;  %v1651_v62 = vrot.slane %v1576_v35, 7  ;;  %v1488_v43 = vunpack.c.0.s8 %v1456_v61  ;;  %v3661_v36 = vld [vmem:[#allocation18_spill] sm:$0xff]  ;;  %v3662_v31 = vld [vmem:[#allocation19_spill] sm:$0xff]  ;;  %v3663_v56 = vld [vmem:[#allocation20_spill] sm:$0xff] }
 0x282   : > { %v1581_v4 = vmul.f32 %v3026_v22, %v1548_v50  ;;  %v1653_v49 = vrot.slane %v1577_v20, 6  ;;  %v1489_v23 = vunpack.c.0.s8 %v1457_v47  ;;  %v1490_v15 = vunpack.c.0.s8 %v1458_v10  ;;  %v3664_v3 = vld [vmem:[#allocation21_spill] sm:$0xff]  ;;  %v3665_v33 = vld [vmem:[#allocation22_spill] sm:$0xff] }
 0x283   : > { %v1582_v18 = vmul.f32 %v3026_v22, %v1549_v9  ;;  %vm3634_vm3 = vcmask 1041409   ;;  %v1655_v16 = vrot.slane %v1578_v32, 5  ;;  %v1491_v54 = vunpack.c.0.s8 %v3297_v40 }
 0x284   : > { %v1652_v11 = vsel %vm3634_vm3, %v1651_v62, %v1575_v52  ;;  %vm3635_vm9 = vcmask 1042434   ;;  %v1657_v26 = vrot.slane %v1579_v24, 4  ;;  %v1492_v38 = vunpack.c.0.s8 %v1460_v59 }
 0x285   : > { %v1654_v0 = vsel %vm3635_vm9, %v1653_v49, %v1652_v11  ;;  %v1493_v34 = vunpack.c.0.s8 %v1461_v19  ;;  %vm3636_vm12 = vcmask 1043459   ;;  %v1659_v2 = vrot.slane %v1580_v58, 3 }
 0x286   : > { %v1656_v48 = vsel %vm3636_vm12, %v1655_v16, %v1654_v0  ;;  %vm3337_vm13 = vcmp.ne.s32.totalorder %v1486_v41, 0  ;;  %vm3341_vm0 = vcmp.ne.s32.totalorder %v1487_v17, 0  ;;  %v2063_v1 = vpop.eup %2062  ;;  %vm3641_vm15 = vcmask 1044484  }
 0x287   : > { %v1658_v46 = vsel %vm3641_vm15, %v1657_v26, %v1656_v48  ;;  %v1661_v61 = vrot.slane %v1581_v4, 2  ;;  %vm3346_vm8 = vcmp.ne.s32.totalorder %v1488_v43, 0  ;;  %vm3350_vm1 = vcmp.ne.s32.totalorder %v1489_v23, 0 }
 0x288   : > { %vm3646_vm2 = vcmask 1045509   ;;  %v1663_v41 = vrot.slane %v1582_v18, 1  ;;  %vm3355_vm4 = vcmp.ne.s32.totalorder %v1490_v15, 0  ;;  %v1245_v40 = vmul.f32 0.6931472, %v2063_v1 }
 0x289   : > { %v1660_v10 = vsel %vm3646_vm2, %v1659_v2, %v1658_v46  ;;  %vm3649_vm5 = vcmask 1046534   ;;  %vm3360_vm14 = vcmp.ne.s32.totalorder %v1491_v54, 0  ;;  %vm3364_vm7 = vcmp.ne.s32.totalorder %v1492_v38, 0 }
 0x28a   : > { %v1662_v59 = vsel %vm3649_vm5, %v1661_v61, %v1660_v10  ;;  %vm3368_vm6 = vcmp.ne.s32.totalorder %v1493_v34, 0  ;;  %vm3656_vm10 = vcmask 1047559   ;;  %v1271_v7 = vrot.slane %v1245_v40, 1 }
 0x28b   : > { %v1664_v5 = vsel %vm3656_vm10, %v1663_v41, %v1662_v59  ;;  %v1272_v30 = vrot.slane %v1245_v40, 2  ;;  %v1273_v39 = vrot.slane %v1245_v40, 3  ;;  %vm3657_vm11 = vcmask 605184  }
 0x28c   : > { %1685 = vst.msk [vmem:[%s3204_s8 + $0x10] sm:$0xff] %vm3657_vm11, %v1664_v5  ;;  %v1274_v29 = vrot.slane %v1245_v40, 4  ;;  %v1275_v21 = vrot.slane %v1245_v40, 5  ;;  %v1276_v6 = vrot.slane %v1245_v40, 6  ;;  %v1277_v44 = vrot.slane %v1245_v40, 7 }
 0x28d   : > { %v1334_v45 = vsub.f32 %v3658_v42, %v1245_v40  ;;  %v1335_v27 = vsub.f32 %v3659_v60, %v1271_v7  ;;  %v1336_v57 = vsub.f32 %v3660_v63, %v1272_v30  ;;  %v1337_v14 = vsub.f32 %v3661_v36, %v1273_v39 }
 0x28e   : > { %v1338_v12 = vsub.f32 %v3662_v31, %v1274_v29  ;;  %v1339_v8 = vsub.f32 %v3663_v56, %v1275_v21  ;;  %v1340_v17 = vsub.f32 %v3664_v3, %v1276_v6  ;;  %v1341_v13 = vsub.f32 %v3665_v33, %v1277_v44 }
 0x28f   : > { %v1550_v50 = vsel %vm3337_vm13, -1e+08, %v1334_v45  ;;  %v1551_v35 = vsel %vm3341_vm0, -1e+08, %v1335_v27  ;;  %v1552_v9 = vsel %vm3346_vm8, -1e+08, %v1336_v57  ;;  %vm3666_vm13 = vmmov %vm3641_vm15 }
 0x290   : > { %v1553_v20 = vsel %vm3350_vm1, -1e+08, %v1337_v14  ;;  %v1554_v32 = vsel %vm3355_vm4, -1e+08, %v1338_v12  ;;  %v1555_v24 = vsel %vm3360_vm14, -1e+08, %v1339_v8  ;;  %v1584_v58 = vmul.f32 %v3026_v22, %v1551_v35  ;;  %vm3667_vm0 = vmmov %vm3646_vm2 }
 0x291   : > { %v1556_v52 = vsel %vm3364_vm7, -1e+08, %v1340_v17  ;;  %v1585_v62 = vmul.f32 %v3026_v22, %v1552_v9  ;;  %v1557_v43 = vsel %vm3368_vm6, -1e+08, %v1341_v13  ;;  %v1586_v4 = vmul.f32 %v3026_v22, %v1553_v20  ;;  %vm3668_vm15 = vmmov %vm3649_vm5 }
 0x292   : > { %v1587_v49 = vmul.f32 %v3026_v22, %v1554_v32  ;;  %v1583_v23 = vmul.f32 %v3026_v22, %v1550_v50  ;;  %v1588_v15 = vmul.f32 %v3026_v22, %v1555_v24  ;;  %v1665_v18 = vrot.slane %v1584_v58, 7  ;;  %vm3669_vm8 = vmmov %vm3656_vm10 }
 0x293   : > { %v1667_v11 = vrot.slane %v1585_v62, 6  ;;  %v1589_v16 = vmul.f32 %v3026_v22, %v1556_v52  ;;  %v1590_v54 = vmul.f32 %v3026_v22, %v1557_v43  ;;  %v1669_v26 = vrot.slane %v1586_v4, 5  ;;  %vm3670_vm1 = vmmov %vm3657_vm11 }
 0x294   : > { %v1666_v0 = vsel %vm3634_vm3, %v1665_v18, %v1583_v23  ;;  %v1671_v34 = vrot.slane %v1587_v49, 4  ;;  %v1673_v2 = vrot.slane %v1588_v15, 3 }
 0x295   : > { %v1668_v38 = vsel %vm3635_vm9, %v1667_v11, %v1666_v0  ;;  %v1675_v25 = vrot.slane %v1589_v16, 2  ;;  %v1677_v46 = vrot.slane %v1590_v54, 1 }
 0x296   : > { %v1670_v48 = vsel %vm3636_vm12, %v1669_v26, %v1668_v38 }
 0x297   : > { %v1672_v55 = vsel %vm3666_vm13, %v1671_v34, %v1670_v48  ;;  %1694 = sbr.rel (!%p3671_p13) target bundleno = 695 (0x2b7), region = 56 }
 0x298   : > { %v1674_v1 = vsel %vm3667_vm0, %v1673_v2, %v1672_v55 }
 0x299   : > { %v1676_v61 = vsel %vm3668_vm15, %v1675_v25, %v1674_v1 }
 0x29a   : > { %v1678_v53 = vsel %vm3669_vm8, %v1677_v46, %v1676_v61 }
 0x29b   : > { %1686 = vst.msk [vmem:[%s3204_s8 + $0x18] sm:$0xff] %vm3670_vm1, %v1678_v53 }
 0x29c   : > { %s3681_s28 = smov (!%p1697_p5, %s1696_s28), 4 }
 0x29d   : > { %s3420_s12 = sshll.u32 %s3681_s28, 7 }
 0x29e   : > { %s1701_s7 = ssub.s32 512, %s3420_s12 }
 0x29f   : > { %1702 = vsyncadd %s1688_s16, %s1701_s7  ;;  %p1840_p0 = scmp.ne.s32.totalorder %s3420_s12, 0  ;;  %s1847_s13 = sshll.u32 %s2239_s25, 9 }
 0x2a0   : > { %s3430_s0 = scalar_lea.hbm %s3484_s6, %s1847_s13  ;;  %s1707_s15 = sshll.u32 %s3204_s8, 4  ;;  %s3433_s15 = int_to_ptr.vmem [resolvable:$true] %s1707_s15 }
 0x2a1   : > { %s2105_s17 = scalar_lea.vmem %s3433_s15, %s3420_s12  ;;  %s2180_s19 = smov [#allocation7]  }
 0x2a2   : > { %p2106_p3 = scmp.ne.s32.totalorder %s3433_s15, %s2105_s17  ;;  %s2109_s20 = sshll.u32 %s2180_s19, 4  ;;  %s2110_s20 = int_to_ptr.vmem [resolvable:$false] %s2109_s20 }
 0x2a3   : > { %s2111_s25 = scalar_lea.vmem %s2110_s20, 1024  ;;  %p2112_p9 = scmp.lt.s32.totalorder %s3433_s15, %s2110_s20 }
 0x2a4   : > { %p2107_p7 = pnand %p2106_p3, %p1840_p0  ;;  %p2113_p10 = scmp.lt.s32.totalorder %s2111_s25, %s2105_s17 }
 0x2a6   : > { %p2108_p8 = pneg %p2107_p7  ;;  %p2114_p1 = por %p2113_p10, %p2112_p9 }
 0x2a8   : > { %p2115_p11 = pnand %p2114_p1, %p2108_p8 }
 0x2aa   : > { %2118 = shalt.err (!%p2115_p11)
}
 0x2ab   : > { %s2119_s26 = scalar_lea.hbm %s3430_s0, %s3420_s12  ;;  %s2123_s8 = scalar_lea.hbm %s3484_s6, 768 }
 0x2ac   : > { %p2120_p12 = scmp.ne.s32.totalorder %s3430_s0, %s2119_s26  ;;  %p2124_p4 = scmp.lt.s32.totalorder %s3430_s0, %s3484_s6 }
 0x2ad   : > { %p2125_p13 = scmp.lt.s32.totalorder %s2123_s8, %s2119_s26 }
 0x2ae   : > { %p2121_p2 = pnand %p2120_p12, %p1840_p0 }
 0x2af   : > { %p2126_p5 = por %p2125_p13, %p2124_p4 }
 0x2b0   : > { %p2122_p6 = pneg %p2121_p2 }
 0x2b2   : > { %p2127_p3 = pnand %p2126_p5, %p2122_p6 }
 0x2b4   : > { %2130 = shalt.err (!%p2127_p3)
}
 0x2b5   : > { %s2181_s13 = smov 128   ;;  %s2182_s9 = smov 8  }
 0x2b6   : > { %1713 = dma.vmem_to_hbm [thread:$0]  (%p1840_p0), %s3433_s15, %s3420_s12, %s3430_s0, %s1688_s16, %s2181_s13, %s2181_s13, %s2182_s9  }
 0x2b7 PF: > { %s1722_s14 = sand.u32 1, %s2161_s21   ;;  %p3672_p7 = scmp.ne.s32.totalorder %s3513_s10, 0 }
 0x2b8   : > { %p3673_p8 = scmp.ge.s32.totalorder %s2173_s24, 2  ;;  %s1723_s17 = scalar_lea.sflag [#allocation4], %s1722_s14 }
 0x2ba   : > { %p1947_p9 = pnand %p3673_p8, %p3672_p7 }
 0x2bc   : > { %p1948_p10 = pneg %p1947_p9 }
 0x2be   : > { %2156 = dma.done.wait (%p1948_p10), %s1723_s17, 512  }
 0x2bf   : > { %2158 = vsyncadd (%p1948_p10), %s1723_s17, 4294966784  ;;  %p20_p1 = scmp.ge.s32.totalorder %s2243_s27, 4   ;;  %s3674_s21 = smov %s2165_s22 }
 0x2c0   : > { %s3675_s22 = smov %s2169_s23  ;;  %s3676_s23 = smov %s2255_s30 }
 0x2c1   : > { %s3677_s24 = smov %s2243_s27  ;;  %22 = sbr.rel (!%p20_p1) target bundleno = 8 (0x8), region = 100 }
 0x2c6   :  { %1728 = vsyncpa [#allocation3], 1 }
 0x2c7   :  { %1730 = vsyncpa [#allocation3 + $0x1], 1 }
 0x2c8   :  { %1731 = vsyncpa [#allocation4], 1 }
 0x2c9   :  { %1733 = vsyncpa [#allocation4 + $0x1], 1 }
 0x2ca   :  { %1734 = vsyncpa [#allocation5], 1 }
 0x2cb   :  { %1736 = vsyncpa [#allocation5 + $0x1], 1 }

</bundles_post_ra>
